<compile_context>
chip_gen: v7x
topology: tpu7x:2x2x1
jax: 0.10.0
libtpu: 0.0.40
codegen_flags: <defaults>
</compile_context>

<pallas_src>
import functools

import jax
import jax.numpy as jnp
from jax.experimental import pallas as pl
from jax.experimental.pallas import tpu as pltpu


# ----------------------------- fused kernel ---------------------------------

def fused_deepset_kernel(x_ref, *refs, relu_flags, num_dec_layers, n):
    """Entire DenseDeepSet forward for one batch tile of TB sets.

    refs layout (out_ref last):
      block 0              : w1, b1, w2, b2, w3, b3, w4, b4             (8)
      blocks 1..nb-1       : w1_enc, w1_dec, b1, w2, b2, w3, b3, w4, b4 (9 each)
      decoder layer 0      : w_enc, w_dec, b                            (3)
      decoder layers 1..   : w, b                                       (2 each)
    Weights are bf16; biases stay f32 (1, F).
    """
    num_blocks = len(relu_flags)
    out_ref = refs[-1]
    prefs = refs[:-1]
    idx = 0

    def take(k):
        nonlocal idx
        out = prefs[idx:idx + k]
        idx += k
        return out

    def mxu(a, w_ref):
        # bf16 x bf16 MXU matmul with f32 accumulation; elementwise stays f32.
        return jnp.dot(a.astype(jnp.bfloat16), w_ref[...],
                       preferred_element_type=jnp.float32)

    rows_total, _ = x_ref.shape
    tb = rows_total // n
    inv_n = jnp.float32(1.0 / n)

    rows = x_ref[...]                                     # (TB*N, Din) f32

    x_enc = None   # (TB*N, E) encoder-path activation (per set element)
    x_dec = None   # (TB, D)   decoder-path activation (per set, NOT replicated)
    for i in range(num_blocks):
        if i == 0:
            w1, b1, w2, b2, w3, b3, w4, b4 = take(8)
            pre = mxu(rows, w1) + b1[...]                               # (TB*N, H)
        else:
            w1e, w1d, b1, w2, b2, w3, b3, w4, b4 = take(9)
            # concat-free first Linear of the block:
            #   [x_enc | bcast(x_dec)] @ W1 = x_enc @ W1[:E] + bcast(x_dec @ W1[E:])
            pre_enc = mxu(x_enc, w1e)                                   # (TB*N, H)
            pre_dec = mxu(x_dec, w1d) + b1[...]                         # (TB, H)
            h_dim = pre_enc.shape[1]
            pre = (pre_enc.reshape(tb, n, h_dim)
                   + pre_dec[:, None, :]).reshape(tb * n, h_dim)

        h = jnp.maximum(pre, 0.0)
        xe = mxu(h, w2) + b2[...]                                       # (TB*N, E)
        e_dim = xe.shape[1]
        m = jnp.sum(xe.reshape(tb, n, e_dim), axis=1) * inv_n           # (TB, E)
        h2 = jnp.maximum(mxu(m, w3) + b3[...], 0.0)                     # (TB, H)
        xd = mxu(h2, w4) + b4[...]                                      # (TB, D)

        if relu_flags[i]:
            # relu(concat(a, bcast(b))) == concat(relu(a), bcast(relu(b)))
            xe = jnp.maximum(xe, 0.0)
            xd = jnp.maximum(xd, 0.0)
        x_enc, x_dec = xe, xd

    # Fused final set-mean: mean_N([x_enc | bcast(x_dec)]) = [mean_N(x_enc), x_dec]
    e_dim = x_enc.shape[1]
    m_enc = jnp.sum(x_enc.reshape(tb, n, e_dim), axis=1) * inv_n        # (TB, E)

    # MLP decoder on the pooled features (first layer split -> no lane concat).
    y = None
    for j in range(num_dec_layers):
        if j == 0:
            we, wd, b = take(3)
            y = mxu(m_enc, we) + mxu(x_dec, wd) + b[...]
        else:
            w, b = take(2)
            y = mxu(y, w) + b[...]
        if j < num_dec_layers - 1:
            y = jnp.maximum(y, 0.0)

    out_ref[...] = y                                                    # (TB, out_pad)


# ----------------------------- wrapper ---------------------------------------

def _round_up(x, m):
    return ((x + m - 1) // m) * m


def _choose_batch_tile(B, N, per_set_bytes, tile_budget_bytes, target_rows=1024):
    """Largest batch tile TB dividing B under the VMEM budget, keeping the
    output block's leading dim layout-legal (TB % 8 == 0 or TB == B) and
    preferring a grid of >= 2 steps (megacore / v7x dual-TC sharding)."""
    cap = max(1, min(B,
                     max(1, tile_budget_bytes // max(per_set_bytes, 1)),
                     max(1, target_rows // max(N, 1))))

    def ok(tb):
        return B % tb == 0 and (tb % 8 == 0 or tb == B)

    cands = [tb for tb in range(1, cap + 1) if ok(tb)]
    if not cands:
        return B                      # fall back: single step with full batch
    multi = [tb for tb in cands if B // tb >= 2]
    return max(multi) if multi else max(cands)


def dense_deepset_forward(x, blocks, dec_params, num_outputs, dim_output):
    """x: (B, N, dim_input) -> squeezed (B, num_outputs, dim_output)."""
    B, N, Din = x.shape
    num_dec_layers = len(dec_params) // 2
    relu_flags = tuple(bool(r) for _, r in blocks)

    def bf16(a):
        return a.astype(jnp.bfloat16)

    # Flatten params.  "Concat-consuming" weights are split on the host (no
    # misaligned slicing in the kernel); matmul weights go bf16, biases stay f32.
    flat = []
    widths = [Din]
    E_prev = None
    for i, (params, _relu) in enumerate(blocks):
        w1, b1, w2, b2, w3, b3, w4, b4 = params
        widths += [w1.shape[1], w2.shape[1], w3.shape[1], w4.shape[1]]
        if i == 0:
            flat += [bf16(w1), b1, bf16(w2), b2, bf16(w3), b3, bf16(w4), b4]
        else:
            flat += [bf16(w1[:E_prev]), bf16(w1[E_prev:]), b1,
                     bf16(w2), b2, bf16(w3), b3, bf16(w4), b4]
        E_prev = w2.shape[1]

    dec_ws = [dec_params[2 * j] for j in range(num_dec_layers)]
    dec_bs = [dec_params[2 * j + 1] for j in range(num_dec_layers)]
    out_dim = dec_ws[-1].shape[1]
    out_pad = _round_up(out_dim, 128)          # lane-dense output stores
    if out_pad != out_dim:
        dec_ws[-1] = jnp.pad(dec_ws[-1], ((0, 0), (0, out_pad - out_dim)))
        dec_bs[-1] = jnp.pad(dec_bs[-1], ((0, 0), (0, out_pad - out_dim)))
    widths += [w.shape[1] for w in dec_ws]
    flat += [bf16(dec_ws[0][:E_prev]), bf16(dec_ws[0][E_prev:]), dec_bs[0]]
    for j in range(1, num_dec_layers):
        flat += [bf16(dec_ws[j]), dec_bs[j]]

    # ---- VMEM budget -> batch tile ------------------------------------------
    try:
        vmem_cap = int(pltpu.get_tpu_info().vmem_capacity_bytes)
    except Exception:
        vmem_cap = 64 * 1024 * 1024            # conservative (v7x per-TC)
    vmem_limit = min(int(0.9 * vmem_cap), 128 * 1024 * 1024)

    weight_bytes = sum(int(p.size) * p.dtype.itemsize for p in flat)
    max_w = max(widths)
    per_set_bytes = (N * max_w * 4 * 6          # several live (N, max_w) temps
                     + max_w * 4 * 8            # per-set (1, max_w) temps
                     + N * Din * 4 * 2          # double-buffered input block
                     + out_pad * 4 * 2)         # double-buffered output block
    tile_budget = vmem_limit - 2 * weight_bytes - (4 << 20)
    TB = _choose_batch_tile(B, N, per_set_bytes, max(tile_budget, 0))
    grid = (B // TB,)

    x2d = x.reshape(B * N, Din)                 # host-side flatten: 2-D blocks

    kernel = functools.partial(fused_deepset_kernel,
                               relu_flags=relu_flags,
                               num_dec_layers=num_dec_layers,
                               n=N)

    def run(single_buffer_weights):
        in_specs = [pl.BlockSpec((TB * N, Din), lambda i: (i, 0))]
        wkwargs = ({"pipeline_mode": pl.Buffered(1)}
                   if single_buffer_weights else {})
        # Weights/biases: full-array blocks, constant index_map -> VMEM-resident.
        for p in flat:
            in_specs.append(pl.BlockSpec(p.shape, lambda i: (0, 0), **wkwargs))
        return pl.pallas_call(
            kernel,
            out_shape=jax.ShapeDtypeStruct((B, out_pad), jnp.float32),
            grid=grid,
            in_specs=in_specs,
            out_specs=pl.BlockSpec((TB, out_pad), lambda i: (i, 0)),
            compiler_params=pltpu.CompilerParams(
                dimension_semantics=("parallel",),
                vmem_limit_bytes=vmem_limit),
        )(x2d, *flat)

    try:
        y = run(single_buffer_weights=True)     # constant weights: 1 buffer
    except Exception:
        # Fallback for jax versions without BlockSpec pipeline_mode / Buffered(1).
        y = run(single_buffer_weights=False)

    y = y[:, :out_dim].reshape(-1, num_outputs, dim_output)
    return jnp.squeeze(y)                       # matches torch .squeeze()


# ------------------------- parameter init -----------------------------------

def init_linear(key, fan_in, fan_out):
    """PyTorch nn.Linear default init; bias kept 2-D (1, fan_out) for TPU layout."""
    kw, kb = jax.random.split(key)
    bound = 1.0 / float(fan_in) ** 0.5
    w = jax.random.uniform(kw, (fan_in, fan_out), jnp.float32, -bound, bound)
    b = jax.random.uniform(kb, (1, fan_out), jnp.float32, -bound, bound)
    return w, b


def init_dense_deepset(key, dim_input, num_outputs, dim_output,
                       num_encoder_blocks, num_decoder_layers, dim_hidden):
    assert num_encoder_blocks >= 2 and num_decoder_layers >= 2
    dim_dec = int(0.25 * dim_hidden)
    dim_enc_out = dim_hidden - dim_dec
    blocks = []
    din = dim_input
    for i in range(num_encoder_blocks):
        key, k1, k2, k3, k4 = jax.random.split(key, 5)
        w1, b1 = init_linear(k1, din, dim_hidden)
        w2, b2 = init_linear(k2, dim_hidden, dim_enc_out)
        w3, b3 = init_linear(k3, dim_enc_out, dim_hidden)
        w4, b4 = init_linear(k4, dim_hidden, dim_dec)
        apply_relu = i < num_encoder_blocks - 1   # last block: no output ReLU
        blocks.append(((w1, b1, w2, b2, w3, b3, w4, b4), apply_relu))
        din = dim_hidden
    dec_params = []
    for _ in range(num_decoder_layers - 1):
        key, k = jax.random.split(key)
        dec_params.extend(init_linear(k, dim_hidden, dim_hidden))
    key, k = jax.random.split(key)
    dec_params.extend(init_linear(k, dim_hidden, num_outputs * dim_output))
    return blocks, dec_params


# ------------------------- pure-JAX reference --------------------------------

def ref_forward(x, blocks, dec_params, num_outputs, dim_output):
    """Module's exact structure (concat/repeat/mean), with the kernel's
    precision policy (bf16 dot inputs, f32 accumulation, f32 elementwise)."""
    def dot(a, w):
        return jnp.dot(a.astype(jnp.bfloat16), w.astype(jnp.bfloat16),
                       preferred_element_type=jnp.float32)

    for (w1, b1, w2, b2, w3, b3, w4, b4), apply_relu in blocks:
        h = jnp.maximum(dot(x, w1) + b1, 0.0)
        x_enc = dot(h, w2) + b2
        m = x_enc.mean(axis=-2)
        h2 = jnp.maximum(dot(m, w3) + b3[0], 0.0)
        x_dec = dot(h2, w4) + b4[0]
        x_dec = jnp.broadcast_to(x_dec[:, None, :],
                                 x_enc.shape[:2] + (x_dec.shape[-1],))
        x = jnp.concatenate([x_enc, x_dec], axis=2)
        if apply_relu:
            x = jnp.maximum(x, 0.0)
    y = x.mean(axis=-2)
    n = len(dec_params) // 2
    for i in range(n):
        y = dot(y, dec_params[2 * i]) + dec_params[2 * i + 1][0]
        if i < n - 1:
            y = jnp.maximum(y, 0.0)
    return jnp.squeeze(y.reshape(-1, num_outputs, dim_output))


# ----------------------------------- main ------------------------------------

if __name__ == "__main__":
    B, N = 2, 8                       # batch, set size (num_inputs)
    dim_input, num_outputs, dim_output = 4, 3, 5
    num_encoder_blocks, num_decoder_layers, dim_hidden = 2, 2, 32

    key = jax.random.PRNGKey(0)
    kx, kp = jax.random.split(key)
    x = jax.random.normal(kx, (B, N, dim_input), jnp.float32)
    blocks, dec_params = init_dense_deepset(
        kp, dim_input, num_outputs, dim_output,
        num_encoder_blocks, num_decoder_layers, dim_hidden)

    out = dense_deepset_forward(x, blocks, dec_params, num_outputs, dim_output)
    out = jax.block_until_ready(out)

    ref = ref_forward(x, blocks, dec_params, num_outputs, dim_output)
    assert out.shape == ref.shape == (B, num_outputs, dim_output), (out.shape, ref.shape)
    assert jnp.allclose(out, ref, atol=1e-2, rtol=1e-2), float(jnp.max(jnp.abs(out - ref)))

    print("KERNEL_OK")
</pallas_src>

<mosaic_0001>
module attributes {stable_mosaic.version = 11 : i64} {
  func.func @fused_deepset_kernel(%arg0: i32, %arg1: memref<16x4xf32, #tpu.memory_space<vmem>>, %arg2: memref<4x32xbf16, #tpu.memory_space<vmem>>, %arg3: memref<1x32xf32, #tpu.memory_space<vmem>>, %arg4: memref<32x24xbf16, #tpu.memory_space<vmem>>, %arg5: memref<1x24xf32, #tpu.memory_space<vmem>>, %arg6: memref<24x32xbf16, #tpu.memory_space<vmem>>, %arg7: memref<1x32xf32, #tpu.memory_space<vmem>>, %arg8: memref<32x8xbf16, #tpu.memory_space<vmem>>, %arg9: memref<1x8xf32, #tpu.memory_space<vmem>>, %arg10: memref<24x32xbf16, #tpu.memory_space<vmem>>, %arg11: memref<8x32xbf16, #tpu.memory_space<vmem>>, %arg12: memref<1x32xf32, #tpu.memory_space<vmem>>, %arg13: memref<32x24xbf16, #tpu.memory_space<vmem>>, %arg14: memref<1x24xf32, #tpu.memory_space<vmem>>, %arg15: memref<24x32xbf16, #tpu.memory_space<vmem>>, %arg16: memref<1x32xf32, #tpu.memory_space<vmem>>, %arg17: memref<32x8xbf16, #tpu.memory_space<vmem>>, %arg18: memref<1x8xf32, #tpu.memory_space<vmem>>, %arg19: memref<24x32xbf16, #tpu.memory_space<vmem>>, %arg20: memref<8x32xbf16, #tpu.memory_space<vmem>>, %arg21: memref<1x32xf32, #tpu.memory_space<vmem>>, %arg22: memref<32x128xbf16, #tpu.memory_space<vmem>>, %arg23: memref<1x128xf32, #tpu.memory_space<vmem>>, %arg24: memref<2x128xf32, #tpu.memory_space<vmem>>) attributes {dimension_semantics = [#tpu.dimension_semantics<parallel>], iteration_bounds = array<i64: 1>, scalar_prefetch = 0 : i64, scratch_operands = 0 : i64, tpu.core_type = #tpu.core_type<tc>, window_params = [{transform_indices = @transform_0, window_bounds = array<i64: 16, 4>}, {pipeline_mode = #tpu.pipeline_mode<synchronous>, transform_indices = @transform_1, window_bounds = array<i64: 4, 32>}, {pipeline_mode = #tpu.pipeline_mode<synchronous>, transform_indices = @transform_2, window_bounds = array<i64: 1, 32>}, {pipeline_mode = #tpu.pipeline_mode<synchronous>, transform_indices = @transform_3, window_bounds = array<i64: 32, 24>}, {pipeline_mode = #tpu.pipeline_mode<synchronous>, transform_indices = @transform_4, window_bounds = array<i64: 1, 24>}, {pipeline_mode = #tpu.pipeline_mode<synchronous>, transform_indices = @transform_5, window_bounds = array<i64: 24, 32>}, {pipeline_mode = #tpu.pipeline_mode<synchronous>, transform_indices = @transform_6, window_bounds = array<i64: 1, 32>}, {pipeline_mode = #tpu.pipeline_mode<synchronous>, transform_indices = @transform_7, window_bounds = array<i64: 32, 8>}, {pipeline_mode = #tpu.pipeline_mode<synchronous>, transform_indices = @transform_8, window_bounds = array<i64: 1, 8>}, {pipeline_mode = #tpu.pipeline_mode<synchronous>, transform_indices = @transform_9, window_bounds = array<i64: 24, 32>}, {pipeline_mode = #tpu.pipeline_mode<synchronous>, transform_indices = @transform_10, window_bounds = array<i64: 8, 32>}, {pipeline_mode = #tpu.pipeline_mode<synchronous>, transform_indices = @transform_11, window_bounds = array<i64: 1, 32>}, {pipeline_mode = #tpu.pipeline_mode<synchronous>, transform_indices = @transform_12, window_bounds = array<i64: 32, 24>}, {pipeline_mode = #tpu.pipeline_mode<synchronous>, transform_indices = @transform_13, window_bounds = array<i64: 1, 24>}, {pipeline_mode = #tpu.pipeline_mode<synchronous>, transform_indices = @transform_14, window_bounds = array<i64: 24, 32>}, {pipeline_mode = #tpu.pipeline_mode<synchronous>, transform_indices = @transform_15, window_bounds = array<i64: 1, 32>}, {pipeline_mode = #tpu.pipeline_mode<synchronous>, transform_indices = @transform_16, window_bounds = array<i64: 32, 8>}, {pipeline_mode = #tpu.pipeline_mode<synchronous>, transform_indices = @transform_17, window_bounds = array<i64: 1, 8>}, {pipeline_mode = #tpu.pipeline_mode<synchronous>, transform_indices = @transform_18, window_bounds = array<i64: 24, 32>}, {pipeline_mode = #tpu.pipeline_mode<synchronous>, transform_indices = @transform_19, window_bounds = array<i64: 8, 32>}, {pipeline_mode = #tpu.pipeline_mode<synchronous>, transform_indices = @transform_20, window_bounds = array<i64: 1, 32>}, {pipeline_mode = #tpu.pipeline_mode<synchronous>, transform_indices = @transform_21, window_bounds = array<i64: 32, 128>}, {pipeline_mode = #tpu.pipeline_mode<synchronous>, transform_indices = @transform_22, window_bounds = array<i64: 1, 128>}, {transform_indices = @transform_23, window_bounds = array<i64: 2, 128>}]} {
    %c0 = arith.constant 0 : index
    %c0_0 = arith.constant 0 : index
    %0 = vector.load %arg1[%c0, %c0_0] : memref<16x4xf32, #tpu.memory_space<vmem>>, vector<16x4xf32>
    %1 = arith.truncf %0 : vector<16x4xf32> to vector<16x4xbf16>
    %c0_1 = arith.constant 0 : index
    %c0_2 = arith.constant 0 : index
    %2 = vector.load %arg2[%c0_1, %c0_2] : memref<4x32xbf16, #tpu.memory_space<vmem>>, vector<4x32xbf16>
    %cst = arith.constant dense<0.000000e+00> : vector<16x32xf32>
    %3 = tpu.matmul %1, %2, %cst {dimension_numbers = #tpu.dot_dimension_numbers<[1], [0], [0], [1], [0, 0, 1, 1], [], []>} : vector<16x4xbf16>, vector<4x32xbf16>, vector<16x32xf32> -> vector<16x32xf32>
    %c0_3 = arith.constant 0 : index
    %c0_4 = arith.constant 0 : index
    %4 = vector.load %arg3[%c0_3, %c0_4] : memref<1x32xf32, #tpu.memory_space<vmem>>, vector<1x32xf32>
    %5 = vector.broadcast %4 : vector<1x32xf32> to vector<16x32xf32>
    %6 = arith.addf %3, %5 : vector<16x32xf32>
    %cst_5 = arith.constant 0.000000e+00 : f32
    %7 = vector.broadcast %cst_5 : f32 to vector<16x32xf32>
    %8 = arith.maximumf %6, %7 : vector<16x32xf32>
    %9 = arith.truncf %8 : vector<16x32xf32> to vector<16x32xbf16>
    %c0_6 = arith.constant 0 : index
    %c0_7 = arith.constant 0 : index
    %10 = vector.load %arg4[%c0_6, %c0_7] : memref<32x24xbf16, #tpu.memory_space<vmem>>, vector<32x24xbf16>
    %cst_8 = arith.constant dense<0.000000e+00> : vector<16x24xf32>
    %11 = tpu.matmul %9, %10, %cst_8 {dimension_numbers = #tpu.dot_dimension_numbers<[1], [0], [0], [1], [0, 0, 1, 1], [], []>} : vector<16x32xbf16>, vector<32x24xbf16>, vector<16x24xf32> -> vector<16x24xf32>
    %c0_9 = arith.constant 0 : index
    %c0_10 = arith.constant 0 : index
    %12 = vector.load %arg5[%c0_9, %c0_10] : memref<1x24xf32, #tpu.memory_space<vmem>>, vector<1x24xf32>
    %13 = vector.broadcast %12 : vector<1x24xf32> to vector<16x24xf32>
    %14 = arith.addf %11, %13 : vector<16x24xf32>
    %15 = vector.shape_cast %14 : vector<16x24xf32> to vector<2x8x24xf32>
    %cst_11 = arith.constant dense<0.000000e+00> : vector<2x24xf32>
    %16 = vector.multi_reduction <add>, %15, %cst_11 [1] : vector<2x8x24xf32> to vector<2x24xf32>
    %cst_12 = arith.constant 1.250000e-01 : f32
    %17 = vector.broadcast %cst_12 : f32 to vector<2x24xf32>
    %18 = arith.mulf %16, %17 : vector<2x24xf32>
    %19 = arith.truncf %18 : vector<2x24xf32> to vector<2x24xbf16>
    %c0_13 = arith.constant 0 : index
    %c0_14 = arith.constant 0 : index
    %20 = vector.load %arg6[%c0_13, %c0_14] : memref<24x32xbf16, #tpu.memory_space<vmem>>, vector<24x32xbf16>
    %cst_15 = arith.constant dense<0.000000e+00> : vector<2x32xf32>
    %21 = tpu.matmul %19, %20, %cst_15 {dimension_numbers = #tpu.dot_dimension_numbers<[1], [0], [0], [1], [0, 0, 1, 1], [], []>} : vector<2x24xbf16>, vector<24x32xbf16>, vector<2x32xf32> -> vector<2x32xf32>
    %c0_16 = arith.constant 0 : index
    %c0_17 = arith.constant 0 : index
    %22 = vector.load %arg7[%c0_16, %c0_17] : memref<1x32xf32, #tpu.memory_space<vmem>>, vector<1x32xf32>
    %23 = vector.broadcast %22 : vector<1x32xf32> to vector<2x32xf32>
    %24 = arith.addf %21, %23 : vector<2x32xf32>
    %cst_18 = arith.constant 0.000000e+00 : f32
    %25 = vector.broadcast %cst_18 : f32 to vector<2x32xf32>
    %26 = arith.maximumf %24, %25 : vector<2x32xf32>
    %27 = arith.truncf %26 : vector<2x32xf32> to vector<2x32xbf16>
    %c0_19 = arith.constant 0 : index
    %c0_20 = arith.constant 0 : index
    %28 = vector.load %arg8[%c0_19, %c0_20] : memref<32x8xbf16, #tpu.memory_space<vmem>>, vector<32x8xbf16>
    %cst_21 = arith.constant dense<0.000000e+00> : vector<2x8xf32>
    %29 = tpu.matmul %27, %28, %cst_21 {dimension_numbers = #tpu.dot_dimension_numbers<[1], [0], [0], [1], [0, 0, 1, 1], [], []>} : vector<2x32xbf16>, vector<32x8xbf16>, vector<2x8xf32> -> vector<2x8xf32>
    %c0_22 = arith.constant 0 : index
    %c0_23 = arith.constant 0 : index
    %30 = vector.load %arg9[%c0_22, %c0_23] : memref<1x8xf32, #tpu.memory_space<vmem>>, vector<1x8xf32>
    %31 = vector.broadcast %30 : vector<1x8xf32> to vector<2x8xf32>
    %32 = arith.addf %29, %31 : vector<2x8xf32>
    %cst_24 = arith.constant 0.000000e+00 : f32
    %33 = vector.broadcast %cst_24 : f32 to vector<16x24xf32>
    %34 = arith.maximumf %14, %33 : vector<16x24xf32>
    %cst_25 = arith.constant 0.000000e+00 : f32
    %35 = vector.broadcast %cst_25 : f32 to vector<2x8xf32>
    %36 = arith.maximumf %32, %35 : vector<2x8xf32>
    %37 = arith.truncf %34 : vector<16x24xf32> to vector<16x24xbf16>
    %c0_26 = arith.constant 0 : index
    %c0_27 = arith.constant 0 : index
    %38 = vector.load %arg10[%c0_26, %c0_27] : memref<24x32xbf16, #tpu.memory_space<vmem>>, vector<24x32xbf16>
    %cst_28 = arith.constant dense<0.000000e+00> : vector<16x32xf32>
    %39 = tpu.matmul %37, %38, %cst_28 {dimension_numbers = #tpu.dot_dimension_numbers<[1], [0], [0], [1], [0, 0, 1, 1], [], []>} : vector<16x24xbf16>, vector<24x32xbf16>, vector<16x32xf32> -> vector<16x32xf32>
    %40 = arith.truncf %36 : vector<2x8xf32> to vector<2x8xbf16>
    %c0_29 = arith.constant 0 : index
    %c0_30 = arith.constant 0 : index
    %41 = vector.load %arg11[%c0_29, %c0_30] : memref<8x32xbf16, #tpu.memory_space<vmem>>, vector<8x32xbf16>
    %cst_31 = arith.constant dense<0.000000e+00> : vector<2x32xf32>
    %42 = tpu.matmul %40, %41, %cst_31 {dimension_numbers = #tpu.dot_dimension_numbers<[1], [0], [0], [1], [0, 0, 1, 1], [], []>} : vector<2x8xbf16>, vector<8x32xbf16>, vector<2x32xf32> -> vector<2x32xf32>
    %c0_32 = arith.constant 0 : index
    %c0_33 = arith.constant 0 : index
    %43 = vector.load %arg12[%c0_32, %c0_33] : memref<1x32xf32, #tpu.memory_space<vmem>>, vector<1x32xf32>
    %44 = vector.broadcast %43 : vector<1x32xf32> to vector<2x32xf32>
    %45 = arith.addf %42, %44 : vector<2x32xf32>
    %46 = vector.shape_cast %39 : vector<16x32xf32> to vector<2x8x32xf32>
    %47 = vector.shape_cast %45 : vector<2x32xf32> to vector<2x1x32xf32>
    %48 = vector.broadcast %47 : vector<2x1x32xf32> to vector<2x8x32xf32>
    %49 = arith.addf %46, %48 : vector<2x8x32xf32>
    %50 = vector.shape_cast %49 : vector<2x8x32xf32> to vector<16x32xf32>
    %cst_34 = arith.constant 0.000000e+00 : f32
    %51 = vector.broadcast %cst_34 : f32 to vector<16x32xf32>
    %52 = arith.maximumf %50, %51 : vector<16x32xf32>
    %53 = arith.truncf %52 : vector<16x32xf32> to vector<16x32xbf16>
    %c0_35 = arith.constant 0 : index
    %c0_36 = arith.constant 0 : index
    %54 = vector.load %arg13[%c0_35, %c0_36] : memref<32x24xbf16, #tpu.memory_space<vmem>>, vector<32x24xbf16>
    %cst_37 = arith.constant dense<0.000000e+00> : vector<16x24xf32>
    %55 = tpu.matmul %53, %54, %cst_37 {dimension_numbers = #tpu.dot_dimension_numbers<[1], [0], [0], [1], [0, 0, 1, 1], [], []>} : vector<16x32xbf16>, vector<32x24xbf16>, vector<16x24xf32> -> vector<16x24xf32>
    %c0_38 = arith.constant 0 : index
    %c0_39 = arith.constant 0 : index
    %56 = vector.load %arg14[%c0_38, %c0_39] : memref<1x24xf32, #tpu.memory_space<vmem>>, vector<1x24xf32>
    %57 = vector.broadcast %56 : vector<1x24xf32> to vector<16x24xf32>
    %58 = arith.addf %55, %57 : vector<16x24xf32>
    %59 = vector.shape_cast %58 : vector<16x24xf32> to vector<2x8x24xf32>
    %cst_40 = arith.constant dense<0.000000e+00> : vector<2x24xf32>
    %60 = vector.multi_reduction <add>, %59, %cst_40 [1] : vector<2x8x24xf32> to vector<2x24xf32>
    %cst_41 = arith.constant 1.250000e-01 : f32
    %61 = vector.broadcast %cst_41 : f32 to vector<2x24xf32>
    %62 = arith.mulf %60, %61 : vector<2x24xf32>
    %63 = arith.truncf %62 : vector<2x24xf32> to vector<2x24xbf16>
    %c0_42 = arith.constant 0 : index
    %c0_43 = arith.constant 0 : index
    %64 = vector.load %arg15[%c0_42, %c0_43] : memref<24x32xbf16, #tpu.memory_space<vmem>>, vector<24x32xbf16>
    %cst_44 = arith.constant dense<0.000000e+00> : vector<2x32xf32>
    %65 = tpu.matmul %63, %64, %cst_44 {dimension_numbers = #tpu.dot_dimension_numbers<[1], [0], [0], [1], [0, 0, 1, 1], [], []>} : vector<2x24xbf16>, vector<24x32xbf16>, vector<2x32xf32> -> vector<2x32xf32>
    %c0_45 = arith.constant 0 : index
    %c0_46 = arith.constant 0 : index
    %66 = vector.load %arg16[%c0_45, %c0_46] : memref<1x32xf32, #tpu.memory_space<vmem>>, vector<1x32xf32>
    %67 = vector.broadcast %66 : vector<1x32xf32> to vector<2x32xf32>
    %68 = arith.addf %65, %67 : vector<2x32xf32>
    %cst_47 = arith.constant 0.000000e+00 : f32
    %69 = vector.broadcast %cst_47 : f32 to vector<2x32xf32>
    %70 = arith.maximumf %68, %69 : vector<2x32xf32>
    %71 = arith.truncf %70 : vector<2x32xf32> to vector<2x32xbf16>
    %c0_48 = arith.constant 0 : index
    %c0_49 = arith.constant 0 : index
    %72 = vector.load %arg17[%c0_48, %c0_49] : memref<32x8xbf16, #tpu.memory_space<vmem>>, vector<32x8xbf16>
    %cst_50 = arith.constant dense<0.000000e+00> : vector<2x8xf32>
    %73 = tpu.matmul %71, %72, %cst_50 {dimension_numbers = #tpu.dot_dimension_numbers<[1], [0], [0], [1], [0, 0, 1, 1], [], []>} : vector<2x32xbf16>, vector<32x8xbf16>, vector<2x8xf32> -> vector<2x8xf32>
    %c0_51 = arith.constant 0 : index
    %c0_52 = arith.constant 0 : index
    %74 = vector.load %arg18[%c0_51, %c0_52] : memref<1x8xf32, #tpu.memory_space<vmem>>, vector<1x8xf32>
    %75 = vector.broadcast %74 : vector<1x8xf32> to vector<2x8xf32>
    %76 = arith.addf %73, %75 : vector<2x8xf32>
    %77 = vector.shape_cast %58 : vector<16x24xf32> to vector<2x8x24xf32>
    %cst_53 = arith.constant dense<0.000000e+00> : vector<2x24xf32>
    %78 = vector.multi_reduction <add>, %77, %cst_53 [1] : vector<2x8x24xf32> to vector<2x24xf32>
    %cst_54 = arith.constant 1.250000e-01 : f32
    %79 = vector.broadcast %cst_54 : f32 to vector<2x24xf32>
    %80 = arith.mulf %78, %79 : vector<2x24xf32>
    %81 = arith.truncf %80 : vector<2x24xf32> to vector<2x24xbf16>
    %c0_55 = arith.constant 0 : index
    %c0_56 = arith.constant 0 : index
    %82 = vector.load %arg19[%c0_55, %c0_56] : memref<24x32xbf16, #tpu.memory_space<vmem>>, vector<24x32xbf16>
    %cst_57 = arith.constant dense<0.000000e+00> : vector<2x32xf32>
    %83 = tpu.matmul %81, %82, %cst_57 {dimension_numbers = #tpu.dot_dimension_numbers<[1], [0], [0], [1], [0, 0, 1, 1], [], []>} : vector<2x24xbf16>, vector<24x32xbf16>, vector<2x32xf32> -> vector<2x32xf32>
    %84 = arith.truncf %76 : vector<2x8xf32> to vector<2x8xbf16>
    %c0_58 = arith.constant 0 : index
    %c0_59 = arith.constant 0 : index
    %85 = vector.load %arg20[%c0_58, %c0_59] : memref<8x32xbf16, #tpu.memory_space<vmem>>, vector<8x32xbf16>
    %cst_60 = arith.constant dense<0.000000e+00> : vector<2x32xf32>
    %86 = tpu.matmul %84, %85, %cst_60 {dimension_numbers = #tpu.dot_dimension_numbers<[1], [0], [0], [1], [0, 0, 1, 1], [], []>} : vector<2x8xbf16>, vector<8x32xbf16>, vector<2x32xf32> -> vector<2x32xf32>
    %87 = arith.addf %83, %86 : vector<2x32xf32>
    %c0_61 = arith.constant 0 : index
    %c0_62 = arith.constant 0 : index
    %88 = vector.load %arg21[%c0_61, %c0_62] : memref<1x32xf32, #tpu.memory_space<vmem>>, vector<1x32xf32>
    %89 = vector.broadcast %88 : vector<1x32xf32> to vector<2x32xf32>
    %90 = arith.addf %87, %89 : vector<2x32xf32>
    %cst_63 = arith.constant 0.000000e+00 : f32
    %91 = vector.broadcast %cst_63 : f32 to vector<2x32xf32>
    %92 = arith.maximumf %90, %91 : vector<2x32xf32>
    %93 = arith.truncf %92 : vector<2x32xf32> to vector<2x32xbf16>
    %c0_64 = arith.constant 0 : index
    %c0_65 = arith.constant 0 : index
    %94 = vector.load %arg22[%c0_64, %c0_65] : memref<32x128xbf16, #tpu.memory_space<vmem>>, vector<32x128xbf16>
    %cst_66 = arith.constant dense<0.000000e+00> : vector<2x128xf32>
    %95 = tpu.matmul %93, %94, %cst_66 {dimension_numbers = #tpu.dot_dimension_numbers<[1], [0], [0], [1], [0, 0, 1, 1], [], []>} : vector<2x32xbf16>, vector<32x128xbf16>, vector<2x128xf32> -> vector<2x128xf32>
    %c0_67 = arith.constant 0 : index
    %c0_68 = arith.constant 0 : index
    %96 = vector.load %arg23[%c0_67, %c0_68] : memref<1x128xf32, #tpu.memory_space<vmem>>, vector<1x128xf32>
    %97 = vector.broadcast %96 : vector<1x128xf32> to vector<2x128xf32>
    %98 = arith.addf %95, %97 : vector<2x128xf32>
    %c0_69 = arith.constant 0 : index
    %c0_70 = arith.constant 0 : index
    %99 = vector.load %arg24[%c0_69, %c0_70] : memref<2x128xf32, #tpu.memory_space<vmem>>, vector<2x128xf32>
    tpu.vector_store %arg24[%c0_69, %c0_70], %98 {strides = array<i32>} : memref<2x128xf32, #tpu.memory_space<vmem>>, vector<2x128xf32>,
    return
  }
  func.func @transform_0(%arg0: i32) -> (i32, i32) {
    %c0_i32 = arith.constant 0 : i32
    %c0_i32_0 = arith.constant 0 : i32
    return %arg0, %c0_i32 : i32, i32
  }
  func.func @transform_1(%arg0: i32) -> (i32, i32) {
    %c0_i32 = arith.constant 0 : i32
    %c0_i32_0 = arith.constant 0 : i32
    %c0_i32_1 = arith.constant 0 : i32
    return %c0_i32, %c0_i32_0 : i32, i32
  }
  func.func @transform_2(%arg0: i32) -> (i32, i32) {
    %c0_i32 = arith.constant 0 : i32
    %c0_i32_0 = arith.constant 0 : i32
    %c0_i32_1 = arith.constant 0 : i32
    return %c0_i32, %c0_i32_0 : i32, i32
  }
  func.func @transform_3(%arg0: i32) -> (i32, i32) {
    %c0_i32 = arith.constant 0 : i32
    %c0_i32_0 = arith.constant 0 : i32
    %c0_i32_1 = arith.constant 0 : i32
    return %c0_i32, %c0_i32_0 : i32, i32
  }
  func.func @transform_4(%arg0: i32) -> (i32, i32) {
    %c0_i32 = arith.constant 0 : i32
    %c0_i32_0 = arith.constant 0 : i32
    %c0_i32_1 = arith.constant 0 : i32
    return %c0_i32, %c0_i32_0 : i32, i32
  }
  func.func @transform_5(%arg0: i32) -> (i32, i32) {
    %c0_i32 = arith.constant 0 : i32
    %c0_i32_0 = arith.constant 0 : i32
    %c0_i32_1 = arith.constant 0 : i32
    return %c0_i32, %c0_i32_0 : i32, i32
  }
  func.func @transform_6(%arg0: i32) -> (i32, i32) {
    %c0_i32 = arith.constant 0 : i32
    %c0_i32_0 = arith.constant 0 : i32
    %c0_i32_1 = arith.constant 0 : i32
    return %c0_i32, %c0_i32_0 : i32, i32
  }
  func.func @transform_7(%arg0: i32) -> (i32, i32) {
    %c0_i32 = arith.constant 0 : i32
    %c0_i32_0 = arith.constant 0 : i32
    %c0_i32_1 = arith.constant 0 : i32
    return %c0_i32, %c0_i32_0 : i32, i32
  }
  func.func @transform_8(%arg0: i32) -> (i32, i32) {
    %c0_i32 = arith.constant 0 : i32
    %c0_i32_0 = arith.constant 0 : i32
    %c0_i32_1 = arith.constant 0 : i32
    return %c0_i32, %c0_i32_0 : i32, i32
  }
  func.func @transform_9(%arg0: i32) -> (i32, i32) {
    %c0_i32 = arith.constant 0 : i32
    %c0_i32_0 = arith.constant 0 : i32
    %c0_i32_1 = arith.constant 0 : i32
    return %c0_i32, %c0_i32_0 : i32, i32
  }
  func.func @transform_10(%arg0: i32) -> (i32, i32) {
    %c0_i32 = arith.constant 0 : i32
    %c0_i32_0 = arith.constant 0 : i32
    %c0_i32_1 = arith.constant 0 : i32
    return %c0_i32, %c0_i32_0 : i32, i32
  }
  func.func @transform_11(%arg0: i32) -> (i32, i32) {
    %c0_i32 = arith.constant 0 : i32
    %c0_i32_0 = arith.constant 0 : i32
    %c0_i32_1 = arith.constant 0 : i32
    return %c0_i32, %c0_i32_0 : i32, i32
  }
  func.func @transform_12(%arg0: i32) -> (i32, i32) {
    %c0_i32 = arith.constant 0 : i32
    %c0_i32_0 = arith.constant 0 : i32
    %c0_i32_1 = arith.constant 0 : i32
    return %c0_i32, %c0_i32_0 : i32, i32
  }
  func.func @transform_13(%arg0: i32) -> (i32, i32) {
    %c0_i32 = arith.constant 0 : i32
    %c0_i32_0 = arith.constant 0 : i32
    %c0_i32_1 = arith.constant 0 : i32
    return %c0_i32, %c0_i32_0 : i32, i32
  }
  func.func @transform_14(%arg0: i32) -> (i32, i32) {
    %c0_i32 = arith.constant 0 : i32
    %c0_i32_0 = arith.constant 0 : i32
    %c0_i32_1 = arith.constant 0 : i32
    return %c0_i32, %c0_i32_0 : i32, i32
  }
  func.func @transform_15(%arg0: i32) -> (i32, i32) {
    %c0_i32 = arith.constant 0 : i32
    %c0_i32_0 = arith.constant 0 : i32
    %c0_i32_1 = arith.constant 0 : i32
    return %c0_i32, %c0_i32_0 : i32, i32
  }
  func.func @transform_16(%arg0: i32) -> (i32, i32) {
    %c0_i32 = arith.constant 0 : i32
    %c0_i32_0 = arith.constant 0 : i32
    %c0_i32_1 = arith.constant 0 : i32
    return %c0_i32, %c0_i32_0 : i32, i32
  }
  func.func @transform_17(%arg0: i32) -> (i32, i32) {
    %c0_i32 = arith.constant 0 : i32
    %c0_i32_0 = arith.constant 0 : i32
    %c0_i32_1 = arith.constant 0 : i32
    return %c0_i32, %c0_i32_0 : i32, i32
  }
  func.func @transform_18(%arg0: i32) -> (i32, i32) {
    %c0_i32 = arith.constant 0 : i32
    %c0_i32_0 = arith.constant 0 : i32
    %c0_i32_1 = arith.constant 0 : i32
    return %c0_i32, %c0_i32_0 : i32, i32
  }
  func.func @transform_19(%arg0: i32) -> (i32, i32) {
    %c0_i32 = arith.constant 0 : i32
    %c0_i32_0 = arith.constant 0 : i32
    %c0_i32_1 = arith.constant 0 : i32
    return %c0_i32, %c0_i32_0 : i32, i32
  }
  func.func @transform_20(%arg0: i32) -> (i32, i32) {
    %c0_i32 = arith.constant 0 : i32
    %c0_i32_0 = arith.constant 0 : i32
    %c0_i32_1 = arith.constant 0 : i32
    return %c0_i32, %c0_i32_0 : i32, i32
  }
  func.func @transform_21(%arg0: i32) -> (i32, i32) {
    %c0_i32 = arith.constant 0 : i32
    %c0_i32_0 = arith.constant 0 : i32
    %c0_i32_1 = arith.constant 0 : i32
    return %c0_i32, %c0_i32_0 : i32, i32
  }
  func.func @transform_22(%arg0: i32) -> (i32, i32) {
    %c0_i32 = arith.constant 0 : i32
    %c0_i32_0 = arith.constant 0 : i32
    %c0_i32_1 = arith.constant 0 : i32
    return %c0_i32, %c0_i32_0 : i32, i32
  }
  func.func @transform_23(%arg0: i32) -> (i32, i32) {
    %c0_i32 = arith.constant 0 : i32
    %c0_i32_0 = arith.constant 0 : i32
    return %arg0, %c0_i32 : i32, i32
  }
}

module attributes {stable_mosaic.version = 11 : i64} {
  func.func @fused_deepset_kernel(%arg0: i32, %arg1: memref<16x4xf32, #tpu.memory_space<vmem>>, %arg2: memref<4x32xbf16, #tpu.memory_space<vmem>>, %arg3: memref<1x32xf32, #tpu.memory_space<vmem>>, %arg4: memref<32x24xbf16, #tpu.memory_space<vmem>>, %arg5: memref<1x24xf32, #tpu.memory_space<vmem>>, %arg6: memref<24x32xbf16, #tpu.memory_space<vmem>>, %arg7: memref<1x32xf32, #tpu.memory_space<vmem>>, %arg8: memref<32x8xbf16, #tpu.memory_space<vmem>>, %arg9: memref<1x8xf32, #tpu.memory_space<vmem>>, %arg10: memref<24x32xbf16, #tpu.memory_space<vmem>>, %arg11: memref<8x32xbf16, #tpu.memory_space<vmem>>, %arg12: memref<1x32xf32, #tpu.memory_space<vmem>>, %arg13: memref<32x24xbf16, #tpu.memory_space<vmem>>, %arg14: memref<1x24xf32, #tpu.memory_space<vmem>>, %arg15: memref<24x32xbf16, #tpu.memory_space<vmem>>, %arg16: memref<1x32xf32, #tpu.memory_space<vmem>>, %arg17: memref<32x8xbf16, #tpu.memory_space<vmem>>, %arg18: memref<1x8xf32, #tpu.memory_space<vmem>>, %arg19: memref<24x32xbf16, #tpu.memory_space<vmem>>, %arg20: memref<8x32xbf16, #tpu.memory_space<vmem>>, %arg21: memref<1x32xf32, #tpu.memory_space<vmem>>, %arg22: memref<32x128xbf16, #tpu.memory_space<vmem>>, %arg23: memref<1x128xf32, #tpu.memory_space<vmem>>, %arg24: memref<2x128xf32, #tpu.memory_space<vmem>>) attributes {dimension_semantics = [#tpu.dimension_semantics<parallel>], iteration_bounds = array<i64: 1>, scalar_prefetch = 0 : i64, scratch_operands = 0 : i64, tpu.core_type = #tpu.core_type<tc>, window_params = [{transform_indices = @transform_0, window_bounds = array<i64: 16, 4>}, {pipeline_mode = #tpu.pipeline_mode<synchronous>, transform_indices = @transform_1, window_bounds = array<i64: 4, 32>}, {pipeline_mode = #tpu.pipeline_mode<synchronous>, transform_indices = @transform_2, window_bounds = array<i64: 1, 32>}, {pipeline_mode = #tpu.pipeline_mode<synchronous>, transform_indices = @transform_3, window_bounds = array<i64: 32, 24>}, {pipeline_mode = #tpu.pipeline_mode<synchronous>, transform_indices = @transform_4, window_bounds = array<i64: 1, 24>}, {pipeline_mode = #tpu.pipeline_mode<synchronous>, transform_indices = @transform_5, window_bounds = array<i64: 24, 32>}, {pipeline_mode = #tpu.pipeline_mode<synchronous>, transform_indices = @transform_6, window_bounds = array<i64: 1, 32>}, {pipeline_mode = #tpu.pipeline_mode<synchronous>, transform_indices = @transform_7, window_bounds = array<i64: 32, 8>}, {pipeline_mode = #tpu.pipeline_mode<synchronous>, transform_indices = @transform_8, window_bounds = array<i64: 1, 8>}, {pipeline_mode = #tpu.pipeline_mode<synchronous>, transform_indices = @transform_9, window_bounds = array<i64: 24, 32>}, {pipeline_mode = #tpu.pipeline_mode<synchronous>, transform_indices = @transform_10, window_bounds = array<i64: 8, 32>}, {pipeline_mode = #tpu.pipeline_mode<synchronous>, transform_indices = @transform_11, window_bounds = array<i64: 1, 32>}, {pipeline_mode = #tpu.pipeline_mode<synchronous>, transform_indices = @transform_12, window_bounds = array<i64: 32, 24>}, {pipeline_mode = #tpu.pipeline_mode<synchronous>, transform_indices = @transform_13, window_bounds = array<i64: 1, 24>}, {pipeline_mode = #tpu.pipeline_mode<synchronous>, transform_indices = @transform_14, window_bounds = array<i64: 24, 32>}, {pipeline_mode = #tpu.pipeline_mode<synchronous>, transform_indices = @transform_15, window_bounds = array<i64: 1, 32>}, {pipeline_mode = #tpu.pipeline_mode<synchronous>, transform_indices = @transform_16, window_bounds = array<i64: 32, 8>}, {pipeline_mode = #tpu.pipeline_mode<synchronous>, transform_indices = @transform_17, window_bounds = array<i64: 1, 8>}, {pipeline_mode = #tpu.pipeline_mode<synchronous>, transform_indices = @transform_18, window_bounds = array<i64: 24, 32>}, {pipeline_mode = #tpu.pipeline_mode<synchronous>, transform_indices = @transform_19, window_bounds = array<i64: 8, 32>}, {pipeline_mode = #tpu.pipeline_mode<synchronous>, transform_indices = @transform_20, window_bounds = array<i64: 1, 32>}, {pipeline_mode = #tpu.pipeline_mode<synchronous>, transform_indices = @transform_21, window_bounds = array<i64: 32, 128>}, {pipeline_mode = #tpu.pipeline_mode<synchronous>, transform_indices = @transform_22, window_bounds = array<i64: 1, 128>}, {transform_indices = @transform_23, window_bounds = array<i64: 2, 128>}]} {
    %c0 = arith.constant 0 : index
    %c0_0 = arith.constant 0 : index
    %0 = vector.load %arg1[%c0, %c0_0] : memref<16x4xf32, #tpu.memory_space<vmem>>, vector<16x4xf32>
    %1 = arith.truncf %0 : vector<16x4xf32> to vector<16x4xbf16>
    %c0_1 = arith.constant 0 : index
    %c0_2 = arith.constant 0 : index
    %2 = vector.load %arg2[%c0_1, %c0_2] : memref<4x32xbf16, #tpu.memory_space<vmem>>, vector<4x32xbf16>
    %cst = arith.constant dense<0.000000e+00> : vector<16x32xf32>
    %3 = tpu.matmul %1, %2, %cst {dimension_numbers = #tpu.dot_dimension_numbers<[1], [0], [0], [1], [0, 0, 1, 1], [], []>} : vector<16x4xbf16>, vector<4x32xbf16>, vector<16x32xf32> -> vector<16x32xf32>
    %c0_3 = arith.constant 0 : index
    %c0_4 = arith.constant 0 : index
    %4 = vector.load %arg3[%c0_3, %c0_4] : memref<1x32xf32, #tpu.memory_space<vmem>>, vector<1x32xf32>
    %5 = vector.broadcast %4 : vector<1x32xf32> to vector<16x32xf32>
    %6 = arith.addf %3, %5 : vector<16x32xf32>
    %cst_5 = arith.constant 0.000000e+00 : f32
    %7 = vector.broadcast %cst_5 : f32 to vector<16x32xf32>
    %8 = arith.maximumf %6, %7 : vector<16x32xf32>
    %9 = arith.truncf %8 : vector<16x32xf32> to vector<16x32xbf16>
    %c0_6 = arith.constant 0 : index
    %c0_7 = arith.constant 0 : index
    %10 = vector.load %arg4[%c0_6, %c0_7] : memref<32x24xbf16, #tpu.memory_space<vmem>>, vector<32x24xbf16>
    %cst_8 = arith.constant dense<0.000000e+00> : vector<16x24xf32>
    %11 = tpu.matmul %9, %10, %cst_8 {dimension_numbers = #tpu.dot_dimension_numbers<[1], [0], [0], [1], [0, 0, 1, 1], [], []>} : vector<16x32xbf16>, vector<32x24xbf16>, vector<16x24xf32> -> vector<16x24xf32>
    %c0_9 = arith.constant 0 : index
    %c0_10 = arith.constant 0 : index
    %12 = vector.load %arg5[%c0_9, %c0_10] : memref<1x24xf32, #tpu.memory_space<vmem>>, vector<1x24xf32>
    %13 = vector.broadcast %12 : vector<1x24xf32> to vector<16x24xf32>
    %14 = arith.addf %11, %13 : vector<16x24xf32>
    %15 = vector.shape_cast %14 : vector<16x24xf32> to vector<2x8x24xf32>
    %cst_11 = arith.constant dense<0.000000e+00> : vector<2x24xf32>
    %16 = vector.multi_reduction <add>, %15, %cst_11 [1] : vector<2x8x24xf32> to vector<2x24xf32>
    %cst_12 = arith.constant 1.250000e-01 : f32
    %17 = vector.broadcast %cst_12 : f32 to vector<2x24xf32>
    %18 = arith.mulf %16, %17 : vector<2x24xf32>
    %19 = arith.truncf %18 : vector<2x24xf32> to vector<2x24xbf16>
    %c0_13 = arith.constant 0 : index
    %c0_14 = arith.constant 0 : index
    %20 = vector.load %arg6[%c0_13, %c0_14] : memref<24x32xbf16, #tpu.memory_space<vmem>>, vector<24x32xbf16>
    %cst_15 = arith.constant dense<0.000000e+00> : vector<2x32xf32>
    %21 = tpu.matmul %19, %20, %cst_15 {dimension_numbers = #tpu.dot_dimension_numbers<[1], [0], [0], [1], [0, 0, 1, 1], [], []>} : vector<2x24xbf16>, vector<24x32xbf16>, vector<2x32xf32> -> vector<2x32xf32>
    %c0_16 = arith.constant 0 : index
    %c0_17 = arith.constant 0 : index
    %22 = vector.load %arg7[%c0_16, %c0_17] : memref<1x32xf32, #tpu.memory_space<vmem>>, vector<1x32xf32>
    %23 = vector.broadcast %22 : vector<1x32xf32> to vector<2x32xf32>
    %24 = arith.addf %21, %23 : vector<2x32xf32>
    %cst_18 = arith.constant 0.000000e+00 : f32
    %25 = vector.broadcast %cst_18 : f32 to vector<2x32xf32>
    %26 = arith.maximumf %24, %25 : vector<2x32xf32>
    %27 = arith.truncf %26 : vector<2x32xf32> to vector<2x32xbf16>
    %c0_19 = arith.constant 0 : index
    %c0_20 = arith.constant 0 : index
    %28 = vector.load %arg8[%c0_19, %c0_20] : memref<32x8xbf16, #tpu.memory_space<vmem>>, vector<32x8xbf16>
    %cst_21 = arith.constant dense<0.000000e+00> : vector<2x8xf32>
    %29 = tpu.matmul %27, %28, %cst_21 {dimension_numbers = #tpu.dot_dimension_numbers<[1], [0], [0], [1], [0, 0, 1, 1], [], []>} : vector<2x32xbf16>, vector<32x8xbf16>, vector<2x8xf32> -> vector<2x8xf32>
    %c0_22 = arith.constant 0 : index
    %c0_23 = arith.constant 0 : index
    %30 = vector.load %arg9[%c0_22, %c0_23] : memref<1x8xf32, #tpu.memory_space<vmem>>, vector<1x8xf32>
    %31 = vector.broadcast %30 : vector<1x8xf32> to vector<2x8xf32>
    %32 = arith.addf %29, %31 : vector<2x8xf32>
    %cst_24 = arith.constant 0.000000e+00 : f32
    %33 = vector.broadcast %cst_24 : f32 to vector<16x24xf32>
    %34 = arith.maximumf %14, %33 : vector<16x24xf32>
    %cst_25 = arith.constant 0.000000e+00 : f32
    %35 = vector.broadcast %cst_25 : f32 to vector<2x8xf32>
    %36 = arith.maximumf %32, %35 : vector<2x8xf32>
    %37 = arith.truncf %34 : vector<16x24xf32> to vector<16x24xbf16>
    %c0_26 = arith.constant 0 : index
    %c0_27 = arith.constant 0 : index
    %38 = vector.load %arg10[%c0_26, %c0_27] : memref<24x32xbf16, #tpu.memory_space<vmem>>, vector<24x32xbf16>
    %cst_28 = arith.constant dense<0.000000e+00> : vector<16x32xf32>
    %39 = tpu.matmul %37, %38, %cst_28 {dimension_numbers = #tpu.dot_dimension_numbers<[1], [0], [0], [1], [0, 0, 1, 1], [], []>} : vector<16x24xbf16>, vector<24x32xbf16>, vector<16x32xf32> -> vector<16x32xf32>
    %40 = arith.truncf %36 : vector<2x8xf32> to vector<2x8xbf16>
    %c0_29 = arith.constant 0 : index
    %c0_30 = arith.constant 0 : index
    %41 = vector.load %arg11[%c0_29, %c0_30] : memref<8x32xbf16, #tpu.memory_space<vmem>>, vector<8x32xbf16>
    %cst_31 = arith.constant dense<0.000000e+00> : vector<2x32xf32>
    %42 = tpu.matmul %40, %41, %cst_31 {dimension_numbers = #tpu.dot_dimension_numbers<[1], [0], [0], [1], [0, 0, 1, 1], [], []>} : vector<2x8xbf16>, vector<8x32xbf16>, vector<2x32xf32> -> vector<2x32xf32>
    %c0_32 = arith.constant 0 : index
    %c0_33 = arith.constant 0 : index
    %43 = vector.load %arg12[%c0_32, %c0_33] : memref<1x32xf32, #tpu.memory_space<vmem>>, vector<1x32xf32>
    %44 = vector.broadcast %43 : vector<1x32xf32> to vector<2x32xf32>
    %45 = arith.addf %42, %44 : vector<2x32xf32>
    %46 = vector.shape_cast %39 : vector<16x32xf32> to vector<2x8x32xf32>
    %47 = vector.shape_cast %45 : vector<2x32xf32> to vector<2x1x32xf32>
    %48 = vector.broadcast %47 : vector<2x1x32xf32> to vector<2x8x32xf32>
    %49 = arith.addf %46, %48 : vector<2x8x32xf32>
    %50 = vector.shape_cast %49 : vector<2x8x32xf32> to vector<16x32xf32>
    %cst_34 = arith.constant 0.000000e+00 : f32
    %51 = vector.broadcast %cst_34 : f32 to vector<16x32xf32>
    %52 = arith.maximumf %50, %51 : vector<16x32xf32>
    %53 = arith.truncf %52 : vector<16x32xf32> to vector<16x32xbf16>
    %c0_35 = arith.constant 0 : index
    %c0_36 = arith.constant 0 : index
    %54 = vector.load %arg13[%c0_35, %c0_36] : memref<32x24xbf16, #tpu.memory_space<vmem>>, vector<32x24xbf16>
    %cst_37 = arith.constant dense<0.000000e+00> : vector<16x24xf32>
    %55 = tpu.matmul %53, %54, %cst_37 {dimension_numbers = #tpu.dot_dimension_numbers<[1], [0], [0], [1], [0, 0, 1, 1], [], []>} : vector<16x32xbf16>, vector<32x24xbf16>, vector<16x24xf32> -> vector<16x24xf32>
    %c0_38 = arith.constant 0 : index
    %c0_39 = arith.constant 0 : index
    %56 = vector.load %arg14[%c0_38, %c0_39] : memref<1x24xf32, #tpu.memory_space<vmem>>, vector<1x24xf32>
    %57 = vector.broadcast %56 : vector<1x24xf32> to vector<16x24xf32>
    %58 = arith.addf %55, %57 : vector<16x24xf32>
    %59 = vector.shape_cast %58 : vector<16x24xf32> to vector<2x8x24xf32>
    %cst_40 = arith.constant dense<0.000000e+00> : vector<2x24xf32>
    %60 = vector.multi_reduction <add>, %59, %cst_40 [1] : vector<2x8x24xf32> to vector<2x24xf32>
    %cst_41 = arith.constant 1.250000e-01 : f32
    %61 = vector.broadcast %cst_41 : f32 to vector<2x24xf32>
    %62 = arith.mulf %60, %61 : vector<2x24xf32>
    %63 = arith.truncf %62 : vector<2x24xf32> to vector<2x24xbf16>
    %c0_42 = arith.constant 0 : index
    %c0_43 = arith.constant 0 : index
    %64 = vector.load %arg15[%c0_42, %c0_43] : memref<24x32xbf16, #tpu.memory_space<vmem>>, vector<24x32xbf16>
    %cst_44 = arith.constant dense<0.000000e+00> : vector<2x32xf32>
    %65 = tpu.matmul %63, %64, %cst_44 {dimension_numbers = #tpu.dot_dimension_numbers<[1], [0], [0], [1], [0, 0, 1, 1], [], []>} : vector<2x24xbf16>, vector<24x32xbf16>, vector<2x32xf32> -> vector<2x32xf32>
    %c0_45 = arith.constant 0 : index
    %c0_46 = arith.constant 0 : index
    %66 = vector.load %arg16[%c0_45, %c0_46] : memref<1x32xf32, #tpu.memory_space<vmem>>, vector<1x32xf32>
    %67 = vector.broadcast %66 : vector<1x32xf32> to vector<2x32xf32>
    %68 = arith.addf %65, %67 : vector<2x32xf32>
    %cst_47 = arith.constant 0.000000e+00 : f32
    %69 = vector.broadcast %cst_47 : f32 to vector<2x32xf32>
    %70 = arith.maximumf %68, %69 : vector<2x32xf32>
    %71 = arith.truncf %70 : vector<2x32xf32> to vector<2x32xbf16>
    %c0_48 = arith.constant 0 : index
    %c0_49 = arith.constant 0 : index
    %72 = vector.load %arg17[%c0_48, %c0_49] : memref<32x8xbf16, #tpu.memory_space<vmem>>, vector<32x8xbf16>
    %cst_50 = arith.constant dense<0.000000e+00> : vector<2x8xf32>
    %73 = tpu.matmul %71, %72, %cst_50 {dimension_numbers = #tpu.dot_dimension_numbers<[1], [0], [0], [1], [0, 0, 1, 1], [], []>} : vector<2x32xbf16>, vector<32x8xbf16>, vector<2x8xf32> -> vector<2x8xf32>
    %c0_51 = arith.constant 0 : index
    %c0_52 = arith.constant 0 : index
    %74 = vector.load %arg18[%c0_51, %c0_52] : memref<1x8xf32, #tpu.memory_space<vmem>>, vector<1x8xf32>
    %75 = vector.broadcast %74 : vector<1x8xf32> to vector<2x8xf32>
    %76 = arith.addf %73, %75 : vector<2x8xf32>
    %77 = vector.shape_cast %58 : vector<16x24xf32> to vector<2x8x24xf32>
    %cst_53 = arith.constant dense<0.000000e+00> : vector<2x24xf32>
    %78 = vector.multi_reduction <add>, %77, %cst_53 [1] : vector<2x8x24xf32> to vector<2x24xf32>
    %cst_54 = arith.constant 1.250000e-01 : f32
    %79 = vector.broadcast %cst_54 : f32 to vector<2x24xf32>
    %80 = arith.mulf %78, %79 : vector<2x24xf32>
    %81 = arith.truncf %80 : vector<2x24xf32> to vector<2x24xbf16>
    %c0_55 = arith.constant 0 : index
    %c0_56 = arith.constant 0 : index
    %82 = vector.load %arg19[%c0_55, %c0_56] : memref<24x32xbf16, #tpu.memory_space<vmem>>, vector<24x32xbf16>
    %cst_57 = arith.constant dense<0.000000e+00> : vector<2x32xf32>
    %83 = tpu.matmul %81, %82, %cst_57 {dimension_numbers = #tpu.dot_dimension_numbers<[1], [0], [0], [1], [0, 0, 1, 1], [], []>} : vector<2x24xbf16>, vector<24x32xbf16>, vector<2x32xf32> -> vector<2x32xf32>
    %84 = arith.truncf %76 : vector<2x8xf32> to vector<2x8xbf16>
    %c0_58 = arith.constant 0 : index
    %c0_59 = arith.constant 0 : index
    %85 = vector.load %arg20[%c0_58, %c0_59] : memref<8x32xbf16, #tpu.memory_space<vmem>>, vector<8x32xbf16>
    %cst_60 = arith.constant dense<0.000000e+00> : vector<2x32xf32>
    %86 = tpu.matmul %84, %85, %cst_60 {dimension_numbers = #tpu.dot_dimension_numbers<[1], [0], [0], [1], [0, 0, 1, 1], [], []>} : vector<2x8xbf16>, vector<8x32xbf16>, vector<2x32xf32> -> vector<2x32xf32>
    %87 = arith.addf %83, %86 : vector<2x32xf32>
    %c0_61 = arith.constant 0 : index
    %c0_62 = arith.constant 0 : index
    %88 = vector.load %arg21[%c0_61, %c0_62] : memref<1x32xf32, #tpu.memory_space<vmem>>, vector<1x32xf32>
    %89 = vector.broadcast %88 : vector<1x32xf32> to vector<2x32xf32>
    %90 = arith.addf %87, %89 : vector<2x32xf32>
    %cst_63 = arith.constant 0.000000e+00 : f32
    %91 = vector.broadcast %cst_63 : f32 to vector<2x32xf32>
    %92 = arith.maximumf %90, %91 : vector<2x32xf32>
    %93 = arith.truncf %92 : vector<2x32xf32> to vector<2x32xbf16>
    %c0_64 = arith.constant 0 : index
    %c0_65 = arith.constant 0 : index
    %94 = vector.load %arg22[%c0_64, %c0_65] : memref<32x128xbf16, #tpu.memory_space<vmem>>, vector<32x128xbf16>
    %cst_66 = arith.constant dense<0.000000e+00> : vector<2x128xf32>
    %95 = tpu.matmul %93, %94, %cst_66 {dimension_numbers = #tpu.dot_dimension_numbers<[1], [0], [0], [1], [0, 0, 1, 1], [], []>} : vector<2x32xbf16>, vector<32x128xbf16>, vector<2x128xf32> -> vector<2x128xf32>
    %c0_67 = arith.constant 0 : index
    %c0_68 = arith.constant 0 : index
    %96 = vector.load %arg23[%c0_67, %c0_68] : memref<1x128xf32, #tpu.memory_space<vmem>>, vector<1x128xf32>
    %97 = vector.broadcast %96 : vector<1x128xf32> to vector<2x128xf32>
    %98 = arith.addf %95, %97 : vector<2x128xf32>
    %c0_69 = arith.constant 0 : index
    %c0_70 = arith.constant 0 : index
    %99 = vector.load %arg24[%c0_69, %c0_70] : memref<2x128xf32, #tpu.memory_space<vmem>>, vector<2x128xf32>
    tpu.vector_store %arg24[%c0_69, %c0_70], %98 {strides = array<i32>} : memref<2x128xf32, #tpu.memory_space<vmem>>, vector<2x128xf32>,
    return
  }
  func.func @transform_0(%arg0: i32) -> (i32, i32) {
    %c0_i32 = arith.constant 0 : i32
    %c0_i32_0 = arith.constant 0 : i32
    return %arg0, %c0_i32 : i32, i32
  }
  func.func @transform_1(%arg0: i32) -> (i32, i32) {
    %c0_i32 = arith.constant 0 : i32
    %c0_i32_0 = arith.constant 0 : i32
    %c0_i32_1 = arith.constant 0 : i32
    return %c0_i32, %c0_i32_0 : i32, i32
  }
  func.func @transform_2(%arg0: i32) -> (i32, i32) {
    %c0_i32 = arith.constant 0 : i32
    %c0_i32_0 = arith.constant 0 : i32
    %c0_i32_1 = arith.constant 0 : i32
    return %c0_i32, %c0_i32_0 : i32, i32
  }
  func.func @transform_3(%arg0: i32) -> (i32, i32) {
    %c0_i32 = arith.constant 0 : i32
    %c0_i32_0 = arith.constant 0 : i32
    %c0_i32_1 = arith.constant 0 : i32
    return %c0_i32, %c0_i32_0 : i32, i32
  }
  func.func @transform_4(%arg0: i32) -> (i32, i32) {
    %c0_i32 = arith.constant 0 : i32
    %c0_i32_0 = arith.constant 0 : i32
    %c0_i32_1 = arith.constant 0 : i32
    return %c0_i32, %c0_i32_0 : i32, i32
  }
  func.func @transform_5(%arg0: i32) -> (i32, i32) {
    %c0_i32 = arith.constant 0 : i32
    %c0_i32_0 = arith.constant 0 : i32
    %c0_i32_1 = arith.constant 0 : i32
    return %c0_i32, %c0_i32_0 : i32, i32
  }
  func.func @transform_6(%arg0: i32) -> (i32, i32) {
    %c0_i32 = arith.constant 0 : i32
    %c0_i32_0 = arith.constant 0 : i32
    %c0_i32_1 = arith.constant 0 : i32
    return %c0_i32, %c0_i32_0 : i32, i32
  }
  func.func @transform_7(%arg0: i32) -> (i32, i32) {
    %c0_i32 = arith.constant 0 : i32
    %c0_i32_0 = arith.constant 0 : i32
    %c0_i32_1 = arith.constant 0 : i32
    return %c0_i32, %c0_i32_0 : i32, i32
  }
  func.func @transform_8(%arg0: i32) -> (i32, i32) {
    %c0_i32 = arith.constant 0 : i32
    %c0_i32_0 = arith.constant 0 : i32
    %c0_i32_1 = arith.constant 0 : i32
    return %c0_i32, %c0_i32_0 : i32, i32
  }
  func.func @transform_9(%arg0: i32) -> (i32, i32) {
    %c0_i32 = arith.constant 0 : i32
    %c0_i32_0 = arith.constant 0 : i32
    %c0_i32_1 = arith.constant 0 : i32
    return %c0_i32, %c0_i32_0 : i32, i32
  }
  func.func @transform_10(%arg0: i32) -> (i32, i32) {
    %c0_i32 = arith.constant 0 : i32
    %c0_i32_0 = arith.constant 0 : i32
    %c0_i32_1 = arith.constant 0 : i32
    return %c0_i32, %c0_i32_0 : i32, i32
  }
  func.func @transform_11(%arg0: i32) -> (i32, i32) {
    %c0_i32 = arith.constant 0 : i32
    %c0_i32_0 = arith.constant 0 : i32
    %c0_i32_1 = arith.constant 0 : i32
    return %c0_i32, %c0_i32_0 : i32, i32
  }
  func.func @transform_12(%arg0: i32) -> (i32, i32) {
    %c0_i32 = arith.constant 0 : i32
    %c0_i32_0 = arith.constant 0 : i32
    %c0_i32_1 = arith.constant 0 : i32
    return %c0_i32, %c0_i32_0 : i32, i32
  }
  func.func @transform_13(%arg0: i32) -> (i32, i32) {
    %c0_i32 = arith.constant 0 : i32
    %c0_i32_0 = arith.constant 0 : i32
    %c0_i32_1 = arith.constant 0 : i32
    return %c0_i32, %c0_i32_0 : i32, i32
  }
  func.func @transform_14(%arg0: i32) -> (i32, i32) {
    %c0_i32 = arith.constant 0 : i32
    %c0_i32_0 = arith.constant 0 : i32
    %c0_i32_1 = arith.constant 0 : i32
    return %c0_i32, %c0_i32_0 : i32, i32
  }
  func.func @transform_15(%arg0: i32) -> (i32, i32) {
    %c0_i32 = arith.constant 0 : i32
    %c0_i32_0 = arith.constant 0 : i32
    %c0_i32_1 = arith.constant 0 : i32
    return %c0_i32, %c0_i32_0 : i32, i32
  }
  func.func @transform_16(%arg0: i32) -> (i32, i32) {
    %c0_i32 = arith.constant 0 : i32
    %c0_i32_0 = arith.constant 0 : i32
    %c0_i32_1 = arith.constant 0 : i32
    return %c0_i32, %c0_i32_0 : i32, i32
  }
  func.func @transform_17(%arg0: i32) -> (i32, i32) {
    %c0_i32 = arith.constant 0 : i32
    %c0_i32_0 = arith.constant 0 : i32
    %c0_i32_1 = arith.constant 0 : i32
    return %c0_i32, %c0_i32_0 : i32, i32
  }
  func.func @transform_18(%arg0: i32) -> (i32, i32) {
    %c0_i32 = arith.constant 0 : i32
    %c0_i32_0 = arith.constant 0 : i32
    %c0_i32_1 = arith.constant 0 : i32
    return %c0_i32, %c0_i32_0 : i32, i32
  }
  func.func @transform_19(%arg0: i32) -> (i32, i32) {
    %c0_i32 = arith.constant 0 : i32
    %c0_i32_0 = arith.constant 0 : i32
    %c0_i32_1 = arith.constant 0 : i32
    return %c0_i32, %c0_i32_0 : i32, i32
  }
  func.func @transform_20(%arg0: i32) -> (i32, i32) {
    %c0_i32 = arith.constant 0 : i32
    %c0_i32_0 = arith.constant 0 : i32
    %c0_i32_1 = arith.constant 0 : i32
    return %c0_i32, %c0_i32_0 : i32, i32
  }
  func.func @transform_21(%arg0: i32) -> (i32, i32) {
    %c0_i32 = arith.constant 0 : i32
    %c0_i32_0 = arith.constant 0 : i32
    %c0_i32_1 = arith.constant 0 : i32
    return %c0_i32, %c0_i32_0 : i32, i32
  }
  func.func @transform_22(%arg0: i32) -> (i32, i32) {
    %c0_i32 = arith.constant 0 : i32
    %c0_i32_0 = arith.constant 0 : i32
    %c0_i32_1 = arith.constant 0 : i32
    return %c0_i32, %c0_i32_0 : i32, i32
  }
  func.func @transform_23(%arg0: i32) -> (i32, i32) {
    %c0_i32 = arith.constant 0 : i32
    %c0_i32_0 = arith.constant 0 : i32
    return %arg0, %c0_i32 : i32, i32
  }
}

</mosaic_0001>

<bundles_post_ra>
// kernel: tpu_custom_call.1
= control target key start
LH: loop header
LB: loop body
LE: loop exit
PB: predicated region body
PF: predicated region fallthrough
CT: control target
= control target key end

     0   :  { %s1454_s0 = inlined_call_operand.vmem [shape: f32[16,4], index: 0, kind: input, shape index: {}]   ;;  %s1455_s1 = inlined_call_operand.vmem [shape: bf16[4,32], index: 1, kind: input, shape index: {}]   ;;  %s1456_s2 = inlined_call_operand.vmem [shape: f32[1,32], index: 2, kind: input, shape index: {}]   ;;  %s1457_s3 = inlined_call_operand.vmem [shape: bf16[32,24], index: 3, kind: input, shape index: {}]   ;;  %s1458_s4 = inlined_call_operand.vmem [shape: f32[1,24], index: 4, kind: input, shape index: {}]   ;;  %s1459_s5 = inlined_call_operand.vmem [shape: bf16[24,32], index: 5, kind: input, shape index: {}]   ;;  %s1460_s6 = inlined_call_operand.vmem [shape: f32[1,32], index: 6, kind: input, shape index: {}]   ;;  %s1461_s7 = inlined_call_operand.vmem [shape: bf16[32,8], index: 7, kind: input, shape index: {}]   ;;  %s1462_s8 = inlined_call_operand.vmem [shape: f32[1,8], index: 8, kind: input, shape index: {}]   ;;  %s1463_s9 = inlined_call_operand.vmem [shape: bf16[24,32], index: 9, kind: input, shape index: {}]   ;;  %s1464_s10 = inlined_call_operand.vmem [shape: bf16[8,32], index: 10, kind: input, shape index: {}]   ;;  %s1465_s11 = inlined_call_operand.vmem [shape: f32[1,32], index: 11, kind: input, shape index: {}]   ;;  %s1466_s12 = inlined_call_operand.vmem [shape: bf16[32,24], index: 12, kind: input, shape index: {}]   ;;  %s1467_s13 = inlined_call_operand.vmem [shape: f32[1,24], index: 13, kind: input, shape index: {}]   ;;  %s1468_s14 = inlined_call_operand.vmem [shape: bf16[24,32], index: 14, kind: input, shape index: {}]   ;;  %s1469_s15 = inlined_call_operand.vmem [shape: f32[1,32], index: 15, kind: input, shape index: {}]   ;;  %s1470_s16 = inlined_call_operand.vmem [shape: bf16[32,8], index: 16, kind: input, shape index: {}]   ;;  %s1471_s17 = inlined_call_operand.vmem [shape: f32[1,8], index: 17, kind: input, shape index: {}]   ;;  %s1472_s18 = inlined_call_operand.vmem [shape: bf16[24,32], index: 18, kind: input, shape index: {}]   ;;  %s1473_s19 = inlined_call_operand.vmem [shape: bf16[8,32], index: 19, kind: input, shape index: {}]   ;;  %s1474_s20 = inlined_call_operand.vmem [shape: f32[1,32], index: 20, kind: input, shape index: {}]   ;;  %s1475_s21 = inlined_call_operand.vmem [shape: bf16[32,128], index: 21, kind: input, shape index: {}]   ;;  %s1476_s22 = inlined_call_operand.vmem [shape: f32[1,128], index: 22, kind: input, shape index: {}]   ;;  %s1477_s23 = inlined_call_operand.hbm [shape: f32[2,128], index: 23, kind: output, shape index: {}]  }
   0x1   :  { %1482 = sst [smem:[#allocation5_spill]] %s1454_s0 }
   0x2   :  { %1483 = sst [smem:[#allocation6_spill]] %s1455_s1 }
   0x3   :  { %1484 = sst [smem:[#allocation7_spill]] %s1456_s2 }
   0x4   :  { %1485 = sst [smem:[#allocation8_spill]] %s1457_s3 }
   0x5   :  { %1486 = sst [smem:[#allocation9_spill]] %s1458_s4 }
   0x6   :  { %1487 = sst [smem:[#allocation10_spill]] %s1459_s5 }
   0x7   :  { %1488 = sst [smem:[#allocation11_spill]] %s1460_s6 }
   0x8   :  { %1489 = sst [smem:[#allocation12_spill]] %s1461_s7 }
   0x9   :  { %s1490_s24 = sld [smem:[#allocation6_spill]]  ;;  %vm91_vm0 = vcmask 1041408   ;;  %s1491_s1 = sld [smem:[#allocation5_spill]]  ;;  %v1151_v2 = vmov 0.0   ;;  %vm1152_vm1 = vmmov 0   ;;  %vm87_vm2 = vcmask 31744  }
   0xa   :  { %1015 = vmatprep.subr.bf16.mxu0 %v1151_v2  ;;  %1017 = vmatprep.mubr.msk.bf16.mxu0 %vm1152_vm1, %v1151_v2 }
   0xb   :  { %1021 = vmatprep.subr.bf16.mxu1 %v1151_v2  ;;  %1025 = vmatprep.mubr.msk.bf16.mxu1 %vm1152_vm1, %v1151_v2 }
   0xf   :  { %v79_v0 = vld [vmem:[%s1490_s24] sm:$0x3]  ;;  %v77_v4 = vld [vmem:[%s1491_s1 + $0x8] sm:$0xff] }
  0x10   :  { %v76_v1 = vld [vmem:[%s1491_s1] sm:$0xff]  ;;  %v93_v3 = vsel %vm91_vm0, %v79_v0, 0 }
  0x11   :  { %1016 = vmatpush3.bf16.msra.mxu0 %v93_v3  ;;  %v78_v5 = vpack.c.bf16 %v77_v4, %v76_v1 }
  0x12   :  { %1029 = vmatprep.subr.bf16.mxu0 %v1151_v2 }
  0x14   :  { %1018 = vmatmul.mubr.msk.bf16.vlgmr.msra.gmra.mrb[0].mxu0 %vm87_vm2, %v78_v5 }
  0x15   :  { %1033 = vmatprep.mubr.msk.bf16.mxu0 %vm1152_vm1, %v1151_v2 }
  0x16   :  { %28 = vsyncpa [#allocation3], 0  ;;  %s1492_s7 = sld [smem:[#allocation8_spill]]  ;;  %s1493_s4 = sld [smem:[#allocation7_spill]]  ;;  %vm162_vm3 = vcmask 261120   ;;  %vm255_vm4 = vcmask 1043456  }
  0x17   :  { %s1494_s25 = sld [smem:[#allocation10_spill]]  ;;  %s1495_s6 = sld [smem:[#allocation12_spill]]  ;;  %vm207_vm5 = vcmask 195584   ;;  %vm240_vm6 = vcmask 1041409   ;;  %v1113_v53 = vld [vmem:[%s1463_s9] sm:$0xff]   ;;  %vm439_vm7 = vcmask 64512  }
  0x18   :  { %s1496_s28 = sld [smem:[#allocation9_spill]]  ;;  %v1114_v55 = vld [vmem:[%s1463_s9 + $0x8] ss:$0 sps:$4 sm:$0xff]   ;;  %s1497_s5 = sld [smem:[#allocation11_spill]]  ;;  %v431_v63 = vld [vmem:[%s1464_s10] sm:$0xf] }
  0x19   :  { %v387_v56 = vsel %vm255_vm4, %v1114_v55, 0  ;;  %v444_v4 = vsel %vm255_vm4, %v431_v63, 0 }
  0x1c   :  { %v1109_v6 = vld [vmem:[%s1492_s7] sm:$0xff]   ;;  %v1110_v7 = vld [vmem:[%s1492_s7 + $0x8] sm:$0xff]  }
  0x1d   :  { %1022 = vmatpush3.bf16.msra.mxu1 %v1109_v6  ;;  %v942_v8 = vld [vmem:[%s1493_s4] ss:$0 sm:$0xff]  ;;  %v1112_v19 = vld [vmem:[%s1494_s25 + $0x8] ss:$0 sps:$4 sm:$0xff]  }
  0x1e   :  { %1023 = vmatprep.subr.bf16.mxu1 %v1151_v2  ;;  %v1111_v18 = vld [vmem:[%s1494_s25] sm:$0xff]   ;;  %v257_v20 = vsel %vm255_vm4, %v1112_v19, 0  ;;  %v1116_v57 = vld [vmem:[%s1495_s6 + $0x8] sm:$0xff]   ;;  %v1153_v19 = vmov 1966171168  }
  0x1f   :  { %1030 = vmatpush3.bf16.msra.mxu0 %v1111_v18  ;;  %v1115_v21 = vld [vmem:[%s1495_s6] sm:$0xff]   ;;  %v1118_v18 = vld [vmem:[%s1466_s12 + $0x8] sm:$0xff]  }
  0x20   :  { %1031 = vmatprep.subr.bf16.mxu0 %v1151_v2  ;;  %v944_v22 = vld [vmem:[%s1496_s28] ss:$0 sm:$0xff] }
  0x21   :  { %1024 = vmatpush3.bf16.msra.mxu1 %v1110_v7  ;;  %v948_v58 = vld [vmem:[%s1497_s5] ss:$0 sm:$0xff] }
  0x22   :  { %1037 = vmatprep.subr.bf16.mxu1 %v1151_v2 }
  0x23   :  { %1032 = vmatpush3.bf16.msra.mxu0 %v257_v20  ;;  %v488_v20 = vunpack.c.l.s4 %v1153_v19 }
  0x24   :  { %1045 = vmatprep.subr.bf16.mxu0 %v1151_v2 }
  0xe7   :  { %v129_v9 = vpop.f32.mrb[0].mxu0 }
  0xe8   :  { %v130_v10 = vadd.f32 %v942_v8, %v129_v9  ;;  %v1019_v11 = vpop.f32.mrb[1].mxu0  ;;  %v952_v9 = vld [vmem:[%s1462_s8] ss:$0 sm:$0xff] }
  0xe9   :  { %v132_v12 = vpop.f32.mrb[2].mxu0 }
  0xea   :  { %v133_v13 = vadd.f32 %v942_v8, %v132_v12  ;;  %v1020_v14 = vpop.f32.mrb[3].mxu0  ;;  %v136_v15 = vmax.f32 %v130_v10, 0.0 }
  0xec   :  { %v137_v16 = vmax.f32 %v133_v13, 0.0 }
  0xee   :  { %v138_v17 = vpack.c.bf16 %v137_v16, %v136_v15 }
  0xf0   :  { %1026 = vmatmul.mubr.msk.bf16.vlgmr.msra.gmra.mrb[0].mxu1 %vm162_vm3, %v138_v17  ;;  %v1117_v17 = vld [vmem:[%s1466_s12] sm:$0xff]  }
  0xf1   :  { %1041 = vmatprep.mubr.msk.bf16.mxu1 %vm1152_vm1, %v1151_v2  ;;  %1038 = vmatpush3.bf16.msra.mxu1 %v1115_v21  ;;  %v490_v21 = vlaneseq }
  0xf2   :  { %1039 = vmatprep.subr.bf16.mxu1 %v1151_v2 }
  0xf5   :  { %1040 = vmatpush3.bf16.msra.mxu1 %v1116_v57 }
  0xf6   :  { %1053 = vmatprep.subr.bf16.mxu1 %v1151_v2 }
 0x1c3   :  { %v200_v23 = vpop.f32.mrb[0].mxu1 }
 0x1c4   :  { %v201_v24 = vadd.f32 %v944_v22, %v200_v23  ;;  %v1027_v25 = vpop.f32.mrb[1].mxu1  ;;  %v491_v23 = vshrl.u32 %v490_v21, 7 }
 0x1c5   :  { %v203_v26 = vpop.f32.mrb[2].mxu1 }
 0x1c6   :  { %v208_v27 = vsel %vm207_vm5, %v201_v24, 0.0  ;;  %v204_v28 = vadd.f32 %v944_v22, %v203_v26  ;;  %v1028_v29 = vpop.f32.mrb[3].mxu1  ;;  %v367_v31 = vmax.f32 %v201_v24, 0.0  ;;  %v489_v22 = vunpack.c.0.s8 %v488_v20  ;;  %v959_v24 = vld [vmem:[%s1465_s11] ss:$0 sm:$0xff] }
 0x1c7   :  { %v209_v30 = vrot.slane %v208_v27, 4 }
 0x1c8   :  { %v215_v32 = vsel %vm207_vm5, %v204_v28, 0.0  ;;  %v368_v33 = vmax.f32 %v204_v28, 0.0  ;;  %v492_v25 = vsub.s32 %v489_v22, %v491_v23 }
 0x1c9   :  { %v210_v34 = vadd.f32 %v209_v30, %v208_v27  ;;  %v216_v35 = vrot.slane %v215_v32, 4 }
 0x1ca   :  { %v370_v36 = vpack.c.bf16 %v368_v33, %v367_v31  ;;  %v511_v31 = vsub.s32 0, %v491_v23  ;;  %v1123_v23 = vld [vmem:[%s1472_s18] sm:$0xff]  }
 0x1cb   :  { %v211_v37 = vrot.slane %v210_v34, 2  ;;  %v217_v38 = vadd.f32 %v216_v35, %v215_v32 }
 0x1cd   :  { %v212_v39 = vadd.f32 %v211_v37, %v210_v34  ;;  %v218_v40 = vrot.slane %v217_v38, 2 }
 0x1cf   :  { %v213_v41 = vrot.slane %v212_v39, 1  ;;  %v219_v42 = vadd.f32 %v218_v40, %v217_v38 }
 0x1d1   :  { %v214_v43 = vadd.f32 %v213_v41, %v212_v39  ;;  %v220_v44 = vrot.slane %v219_v42, 1 }
 0x1d3   :  { %v222_v45 = vmul.f32 0.125, %v214_v43  ;;  %v221_v46 = vadd.f32 %v220_v44, %v219_v42  ;;  %v1119_v43 = vld [vmem:[%s1468_s14] sm:$0xff]   ;;  %v1120_v44 = vld [vmem:[%s1468_s14 + $0x8] ss:$0 sps:$4 sm:$0xff]  }
 0x1d5   :  { %v224_v47 = vpack.c.bf16 %v222_v45, %v222_v45  ;;  %v223_v48 = vmul.f32 0.125, %v221_v46  ;;  %v638_v45 = vsel %vm255_vm4, %v1120_v44, 0  ;;  %v1121_v46 = vld [vmem:[%s1470_s16] sm:$0xff]  }
 0x1d7   :  { %v225_v49 = vpack.c.bf16 %v223_v48, %v223_v48  ;;  %v238_v50 = vunpack.c.l.b16 %v224_v47  ;;  %v961_v47 = vld [vmem:[%s1467_s13] ss:$0 sm:$0xff] }
 0x1d9   :  { %v239_v51 = vunpack.c.l.b16 %v225_v49 }
 0x1db   :  { %v241_v52 = vsel %vm240_vm6, %v239_v51, %v238_v50 }
 0x1dc   :  { %v242_v54 = vpack.c.b16 %v241_v52, %v241_v52 }
 0x1de   :  { %1034 = vmatmul.mubr.msk.bf16.vlgmr.msra.gmra.mrb[4].mxu0 %vm207_vm5, %v242_v54 }
 0x1df   :  { %1046 = vmatpush3.bf16.msra.mxu0 %v1113_v53  ;;  %1049 = vmatprep.mubr.msk.bf16.mxu0 %vm1152_vm1, %v1151_v2 }
 0x1e0   :  { %1047 = vmatprep.subr.bf16.mxu0 %v1151_v2 }
 0x1e3   :  { %1048 = vmatpush3.bf16.msra.mxu0 %v387_v56 }
 0x1e4   :  { %1059 = vmatprep.subr.bf16.mxu0 %v1151_v2 }
 0x1e6   :  { %1050 = vmatmul.mubr.msk.bf16.vlgmr.msra.gmra.mrb[8].mxu0 %vm207_vm5, %v370_v36 }
 0x1e7   :  { %1063 = vmatprep.mubr.msk.bf16.mxu0 %vm1152_vm1, %v1151_v2  ;;  %1060 = vmatpush3.bf16.msra.mxu0 %v1117_v17 }
 0x1e8   :  { %1061 = vmatprep.subr.bf16.mxu0 %v1151_v2 }
 0x1eb   :  { %1062 = vmatpush3.bf16.msra.mxu0 %v1118_v18 }
 0x1ec   :  { %1075 = vmatprep.subr.bf16.mxu0 %v1151_v2 }
 0x2b1   :  { %v293_v59 = vpop.f32.mrb[4].mxu0 }
 0x2b2   :  { %v294_v60 = vadd.f32 %v948_v58, %v293_v59  ;;  %v1035_v61 = vpop.f32.mrb[5].mxu0 }
 0x2b3   :  { %v296_v62 = vpop.f32.mrb[6].mxu0 }
 0x2b4   :  { %v299_v0 = vmax.f32 %v294_v60, 0.0  ;;  %v1036_v1 = vpop.f32.mrb[7].mxu0 }
 0x2b6   :  { %v300_v3 = vpack.c.bf16 %v299_v0, %v299_v0 }
 0x2b8   :  { %1042 = vmatmul.mubr.msk.bf16.vlgmr.msra.gmra.mrb[4].mxu1 %vm162_vm3, %v300_v3 }
 0x2b9   :  { %v423_v5 = vpop.f32.mrb[8].mxu0  ;;  %1054 = vmatpush3.bf16.msra.mxu1 %v444_v4  ;;  %1055 = vmatprep.mubr.msk.bf16.mxu1 %vm1152_vm1, %v1151_v2 }
 0x2ba   :  { %v1051_v6 = vpop.f32.mrb[9].mxu0  ;;  %1067 = vmatprep.subr.bf16.mxu1 %v1151_v2 }
 0x2bb   :  { %v426_v7 = vpop.f32.mrb[10].mxu0 }
 0x2bc   :  { %v1052_v8 = vpop.f32.mrb[11].mxu0 }
 0x38b   :  { %v361_v10 = vpop.f32.mrb[4].mxu1 }
 0x38c   :  { %v362_v11 = vadd.f32 %v952_v9, %v361_v10  ;;  %v1043_v12 = vpop.f32.mrb[5].mxu1 }
 0x38d   :  { %v364_v13 = vpop.f32.mrb[6].mxu1 }
 0x38e   :  { %v369_v14 = vmax.f32 %v362_v11, 0.0  ;;  %v1044_v15 = vpop.f32.mrb[7].mxu1  ;;  %v1122_v13 = vld [vmem:[%s1470_s16 + $0x8] sm:$0xff]  }
 0x390   :  { %v430_v16 = vpack.c.bf16 %v369_v14, %v369_v14  ;;  %v752_v14 = vld [vmem:[%s1473_s19] sm:$0xf] }
 0x391   :  { %v757_v15 = vsel %vm255_vm4, %v752_v14, 0 }
 0x392   :  { %1056 = vmatmul.mubr.msk.bf16.vlgmr.msra.gmra.mrb[8].mxu1 %vm439_vm7, %v430_v16  ;;  %v965_v16 = vld [vmem:[%s1469_s15] ss:$0 sm:$0xff] }
 0x393   :  { %1071 = vmatprep.mubr.msk.bf16.mxu1 %vm1152_vm1, %v1151_v2  ;;  %1068 = vmatpush3.bf16.msra.mxu1 %v1119_v43 }
 0x394   :  { %1069 = vmatprep.subr.bf16.mxu1 %v1151_v2 }
 0x397   :  { %1070 = vmatpush3.bf16.msra.mxu1 %v638_v45 }
 0x398   :  { %1083 = vmatprep.subr.bf16.mxu1 %v1151_v2 }
 0x465   :  { %v480_v26 = vpop.f32.mrb[8].mxu1 }
 0x466   :  { %v481_v27 = vadd.f32 %v959_v24, %v480_v26  ;;  %v1057_v28 = vpop.f32.mrb[9].mxu1 }
 0x467   :  { %v483_v29 = vpop.f32.mrb[10].mxu1 }
 0x468   :  { %v493_v30 = vrot.slane %v481_v27, %v492_v25  ;;  %v1058_v32 = vpop.f32.mrb[11].mxu1  ;;  %v969_v27 = vld [vmem:[%s1471_s17] ss:$0 sm:$0xff] }
 0x46a   :  { %v494_v33 = vcombine.high %v493_v30, %v493_v30  ;;  %v501_v34 = vrot.slane %v493_v30, %v492_v25 }
 0x46c   :  { %v508_v35 = vrot.slane %v494_v33, %v492_v25  ;;  %v512_v36 = vrot.slane %v501_v34, %v511_v31  ;;  %v1124_v25 = vld [vmem:[%s1472_s18 + $0x8] ss:$0 sps:$4 sm:$0xff]  }
 0x46d   :  { %v809_v26 = vsel %vm255_vm4, %v1124_v25, 0 }
 0x46e   :  { %v516_v37 = vrot.slane %v508_v35, %v511_v31  ;;  %v519_v38 = vadd.f32 %v512_v36, %v423_v5 }
 0x470   :  { %v520_v39 = vadd.f32 %v516_v37, %v426_v7  ;;  %v521_v40 = vmax.f32 %v519_v38, 0.0  ;;  %v1125_v38 = vld [vmem:[%s1475_s21] sm:$0xff]  }
 0x472   :  { %v522_v41 = vmax.f32 %v520_v39, 0.0  ;;  %v1126_v39 = vld [vmem:[%s1475_s21 + $0x8] sm:$0xff]   ;;  %s1154_s21 = smov [#allocation2]  }
 0x473   :  { %s934_s12 = sshll.u32 %s1154_s21, 4  ;;  %s935_s12 = int_to_ptr.vmem [resolvable:$true] %s934_s12 }
 0x474   :  { %v523_v42 = vpack.c.bf16 %v522_v41, %v521_v40  ;;  %v977_v41 = vld [vmem:[%s1474_s20] ss:$0 sm:$0xff]  ;;  %s1127_s20 = scalar_lea.vmem %s935_s12, 32  ;;  %p1132_p1 = scmp.lt.s32.totalorder %s935_s12, %s935_s12 }
 0x475   :  { %p1128_p0 = scmp.ne.s32.totalorder %s935_s12, %s1127_s20  ;;  %p1133_p2 = scmp.lt.s32.totalorder %s1127_s20, %s1127_s20 }
 0x476   :  { %1064 = vmatmul.mubr.msk.bf16.vlgmr.msra.gmra.mrb[12].mxu0 %vm162_vm3, %v523_v42 }
 0x477   :  { %1079 = vmatprep.mubr.msk.bf16.mxu0 %vm1152_vm1, %v1151_v2  ;;  %1076 = vmatpush3.bf16.msra.mxu0 %v1121_v46  ;;  %p1134_p3 = por %p1133_p2, %p1132_p1 }
 0x478   :  { %1077 = vmatprep.subr.bf16.mxu0 %v1151_v2 }
 0x479   :  { %p1135_p4 = pnand %p1134_p3, %p1128_p0 }
 0x47b   :  { %1078 = vmatpush3.bf16.msra.mxu0 %v1122_v13 }
 0x47c   :  { %1089 = vmatprep.subr.bf16.mxu0 %v1151_v2 }
 0x549   :  { %v584_v48 = vpop.f32.mrb[12].mxu0 }
 0x54a   :  { %v585_v49 = vadd.f32 %v961_v47, %v584_v48  ;;  %v1065_v50 = vpop.f32.mrb[13].mxu0 }
 0x54b   :  { %v587_v51 = vpop.f32.mrb[14].mxu0 }
 0x54c   :  { %v591_v52 = vsel %vm207_vm5, %v585_v49, 0.0  ;;  %v588_v53 = vadd.f32 %v961_v47, %v587_v51  ;;  %v1066_v54 = vpop.f32.mrb[15].mxu0 }
 0x54d   :  { %v592_v55 = vrot.slane %v591_v52, 4 }
 0x54e   :  { %v598_v56 = vsel %vm207_vm5, %v588_v53, 0.0 }
 0x54f   :  { %v593_v57 = vadd.f32 %v592_v55, %v591_v52  ;;  %v599_v58 = vrot.slane %v598_v56, 4 }
 0x551   :  { %v594_v59 = vrot.slane %v593_v57, 2  ;;  %v600_v60 = vadd.f32 %v599_v58, %v598_v56 }
 0x553   :  { %v595_v61 = vadd.f32 %v594_v59, %v593_v57  ;;  %v601_v62 = vrot.slane %v600_v60, 2 }
 0x555   :  { %v596_v63 = vrot.slane %v595_v61, 1  ;;  %v602_v0 = vadd.f32 %v601_v62, %v600_v60 }
 0x557   :  { %v597_v1 = vadd.f32 %v596_v63, %v595_v61  ;;  %v603_v3 = vrot.slane %v602_v0, 1 }
 0x559   :  { %v605_v4 = vmul.f32 0.125, %v597_v1  ;;  %v604_v5 = vadd.f32 %v603_v3, %v602_v0 }
 0x55b   :  { %v607_v6 = vpack.c.bf16 %v605_v4, %v605_v4  ;;  %v606_v7 = vmul.f32 0.125, %v604_v5 }
 0x55d   :  { %v608_v8 = vpack.c.bf16 %v606_v7, %v606_v7  ;;  %v621_v9 = vunpack.c.l.b16 %v607_v6 }
 0x55f   :  { %v622_v10 = vunpack.c.l.b16 %v608_v8 }
 0x561   :  { %v623_v11 = vsel %vm240_vm6, %v622_v10, %v621_v9 }
 0x562   :  { %v624_v12 = vpack.c.b16 %v623_v11, %v623_v11 }
 0x564   :  { %1072 = vmatmul.mubr.msk.bf16.vlgmr.msra.gmra.mrb[12].mxu1 %vm207_vm5, %v624_v12 }
 0x565   :  { %1085 = vmatprep.mubr.msk.bf16.mxu1 %vm1152_vm1, %v1151_v2  ;;  %1084 = vmatpush3.bf16.msra.mxu1 %v757_v15 }
 0x566   :  { %1097 = vmatprep.subr.bf16.mxu1 %v1151_v2 }
 0x637   :  { %v674_v17 = vpop.f32.mrb[12].mxu1 }
 0x638   :  { %v675_v18 = vadd.f32 %v965_v16, %v674_v17  ;;  %v1073_v19 = vpop.f32.mrb[13].mxu1 }
 0x639   :  { %v677_v20 = vpop.f32.mrb[14].mxu1 }
 0x63a   :  { %v680_v21 = vmax.f32 %v675_v18, 0.0  ;;  %v1074_v22 = vpop.f32.mrb[15].mxu1 }
 0x63c   :  { %v681_v24 = vpack.c.bf16 %v680_v21, %v680_v21 }
 0x63e   :  { %1080 = vmatmul.mubr.msk.bf16.vlgmr.msra.gmra.mrb[16].mxu0 %vm162_vm3, %v681_v24 }
 0x63f   :  { %1090 = vmatpush3.bf16.msra.mxu0 %v1123_v23  ;;  %1093 = vmatprep.mubr.msk.bf16.mxu0 %vm1152_vm1, %v1151_v2 }
 0x640   :  { %1091 = vmatprep.subr.bf16.mxu0 %v1151_v2 }
 0x643   :  { %1092 = vmatpush3.bf16.msra.mxu0 %v809_v26 }
 0x646   :  { %1094 = vmatmul.mubr.msk.bf16.vlgmr.msra.gmra.mrb[20].mxu0 %vm207_vm5, %v624_v12 }
 0x711   :  { %v742_v28 = vpop.f32.mrb[16].mxu0 }
 0x712   :  { %v743_v29 = vadd.f32 %v969_v27, %v742_v28  ;;  %v1081_v30 = vpop.f32.mrb[17].mxu0 }
 0x713   :  { %v745_v31 = vpop.f32.mrb[18].mxu0 }
 0x714   :  { %v751_v32 = vpack.c.bf16 %v743_v29, %v743_v29  ;;  %v1082_v33 = vpop.f32.mrb[19].mxu0 }
 0x716   :  { %1086 = vmatmul.mubr.msk.bf16.vlgmr.msra.gmra.mrb[16].mxu1 %vm439_vm7, %v751_v32 }
 0x717   :  { %1101 = vmatprep.mubr.msk.bf16.mxu1 %vm1152_vm1, %v1151_v2  ;;  %1098 = vmatpush3.bf16.msra.mxu1 %v1125_v38 }
 0x718   :  { %1099 = vmatprep.subr.bf16.mxu1 %v1151_v2  ;;  %v978_v2 = vld [vmem:[%s1476_s22] ss:$0 sm:$0xff] }
 0x719   :  { %v845_v34 = vpop.f32.mrb[20].mxu0 }
 0x71a   :  { %v1095_v35 = vpop.f32.mrb[21].mxu0 }
 0x71b   :  { %v848_v36 = vpop.f32.mrb[22].mxu0  ;;  %1100 = vmatpush3.bf16.msra.mxu1 %v1126_v39 }
 0x71c   :  { %v1096_v37 = vpop.f32.mrb[23].mxu0 }
 0x7e9   :  { %v793_v40 = vpop.f32.mrb[16].mxu1 }
 0x7ea   :  { %v846_v42 = vadd.f32 %v845_v34, %v793_v40  ;;  %v1087_v43 = vpop.f32.mrb[17].mxu1 }
 0x7eb   :  { %v796_v44 = vpop.f32.mrb[18].mxu1 }
 0x7ec   :  { %v858_v45 = vadd.f32 %v977_v41, %v846_v42  ;;  %v1088_v46 = vpop.f32.mrb[19].mxu1 }
 0x7ee   :  { %v859_v47 = vmax.f32 %v858_v45, 0.0 }
 0x7f0   :  { %v860_v48 = vpack.c.bf16 %v859_v47, %v859_v47 }
 0x7f2   :  { %1102 = vmatmul.mubr.msk.bf16.vlgmr.msra.gmra.mrb[20].mxu1 %vm162_vm3, %v860_v48 }
 0x8c5   :  { %v921_v49 = vpop.f32.mrb[20].mxu1 }
 0x8c6   :  { %v922_v50 = vadd.f32 %v978_v2, %v921_v49  ;;  %v1103_v51 = vpop.f32.mrb[21].mxu1 }
 0x8c7   :  { %v924_v52 = vpop.f32.mrb[22].mxu1 }
 0x8c8   :  { %927 = vst [vmem:[#allocation2] sm:$0x3] %v922_v50  ;;  %v1104_v53 = vpop.f32.mrb[23].mxu1 }
 0x8c9   :  { %1138 = shalt.err (!%p1135_p4)
}
 0x8ca   :  { %s1139_s22 = scalar_lea.hbm %s1477_s23, 32 }
 0x8cb   :  { %p1140_p5 = scmp.ne.s32.totalorder %s1477_s23, %s1139_s22  ;;  %p1143_p6 = scmp.lt.u32.totalorder %s1139_s22, %s1477_s23 }
 0x8cd   :  { %p1145_p7 = pnand %p1143_p6, %p1140_p5 }
 0x8cf   :  { %1148 = shalt.err (!%p1145_p7)
}
 0x8d0   :  { %937 = dma.vmem_to_hbm [thread:$0]  %s935_s12, 32, %s1477_s23, [#allocation3]  }
 0x8d1   :  { %1149 = dma.done.wait [#allocation3], 32  }
 0x8d2   :  { %1150 = vsyncadd [#allocation3], 4294967264 }
 0x8d3   :  { %941 = vsyncpa [#allocation3], 1 }

// kernel: tpu_custom_call.1
= control target key start
LH: loop header
LB: loop body
LE: loop exit
PB: predicated region body
PF: predicated region fallthrough
CT: control target
= control target key end

     0   :  { %s1454_s0 = inlined_call_operand.vmem [shape: f32[16,4], index: 0, kind: input, shape index: {}]   ;;  %s1455_s1 = inlined_call_operand.vmem [shape: bf16[4,32], index: 1, kind: input, shape index: {}]   ;;  %s1456_s2 = inlined_call_operand.vmem [shape: f32[1,32], index: 2, kind: input, shape index: {}]   ;;  %s1457_s3 = inlined_call_operand.vmem [shape: bf16[32,24], index: 3, kind: input, shape index: {}]   ;;  %s1458_s4 = inlined_call_operand.vmem [shape: f32[1,24], index: 4, kind: input, shape index: {}]   ;;  %s1459_s5 = inlined_call_operand.vmem [shape: bf16[24,32], index: 5, kind: input, shape index: {}]   ;;  %s1460_s6 = inlined_call_operand.vmem [shape: f32[1,32], index: 6, kind: input, shape index: {}]   ;;  %s1461_s7 = inlined_call_operand.vmem [shape: bf16[32,8], index: 7, kind: input, shape index: {}]   ;;  %s1462_s8 = inlined_call_operand.vmem [shape: f32[1,8], index: 8, kind: input, shape index: {}]   ;;  %s1463_s9 = inlined_call_operand.vmem [shape: bf16[24,32], index: 9, kind: input, shape index: {}]   ;;  %s1464_s10 = inlined_call_operand.vmem [shape: bf16[8,32], index: 10, kind: input, shape index: {}]   ;;  %s1465_s11 = inlined_call_operand.vmem [shape: f32[1,32], index: 11, kind: input, shape index: {}]   ;;  %s1466_s12 = inlined_call_operand.vmem [shape: bf16[32,24], index: 12, kind: input, shape index: {}]   ;;  %s1467_s13 = inlined_call_operand.vmem [shape: f32[1,24], index: 13, kind: input, shape index: {}]   ;;  %s1468_s14 = inlined_call_operand.vmem [shape: bf16[24,32], index: 14, kind: input, shape index: {}]   ;;  %s1469_s15 = inlined_call_operand.vmem [shape: f32[1,32], index: 15, kind: input, shape index: {}]   ;;  %s1470_s16 = inlined_call_operand.vmem [shape: bf16[32,8], index: 16, kind: input, shape index: {}]   ;;  %s1471_s17 = inlined_call_operand.vmem [shape: f32[1,8], index: 17, kind: input, shape index: {}]   ;;  %s1472_s18 = inlined_call_operand.vmem [shape: bf16[24,32], index: 18, kind: input, shape index: {}]   ;;  %s1473_s19 = inlined_call_operand.vmem [shape: bf16[8,32], index: 19, kind: input, shape index: {}]   ;;  %s1474_s20 = inlined_call_operand.vmem [shape: f32[1,32], index: 20, kind: input, shape index: {}]   ;;  %s1475_s21 = inlined_call_operand.vmem [shape: bf16[32,128], index: 21, kind: input, shape index: {}]   ;;  %s1476_s22 = inlined_call_operand.vmem [shape: f32[1,128], index: 22, kind: input, shape index: {}]   ;;  %s1477_s23 = inlined_call_operand.hbm [shape: f32[2,128], index: 23, kind: output, shape index: {}]  }
   0x1   :  { %1482 = sst [smem:[#allocation5_spill]] %s1454_s0 }
   0x2   :  { %1483 = sst [smem:[#allocation6_spill]] %s1455_s1 }
   0x3   :  { %1484 = sst [smem:[#allocation7_spill]] %s1456_s2 }
   0x4   :  { %1485 = sst [smem:[#allocation8_spill]] %s1457_s3 }
   0x5   :  { %1486 = sst [smem:[#allocation9_spill]] %s1458_s4 }
   0x6   :  { %1487 = sst [smem:[#allocation10_spill]] %s1459_s5 }
   0x7   :  { %1488 = sst [smem:[#allocation11_spill]] %s1460_s6 }
   0x8   :  { %1489 = sst [smem:[#allocation12_spill]] %s1461_s7 }
   0x9   :  { %s1490_s24 = sld [smem:[#allocation6_spill]]  ;;  %vm91_vm0 = vcmask 1041408   ;;  %s1491_s1 = sld [smem:[#allocation5_spill]]  ;;  %v1151_v2 = vmov 0.0   ;;  %vm1152_vm1 = vmmov 0   ;;  %vm87_vm2 = vcmask 31744  }
   0xa   :  { %1015 = vmatprep.subr.bf16.mxu0 %v1151_v2  ;;  %1017 = vmatprep.mubr.msk.bf16.mxu0 %vm1152_vm1, %v1151_v2 }
   0xb   :  { %1021 = vmatprep.subr.bf16.mxu1 %v1151_v2  ;;  %1025 = vmatprep.mubr.msk.bf16.mxu1 %vm1152_vm1, %v1151_v2 }
   0xf   :  { %v79_v0 = vld [vmem:[%s1490_s24] sm:$0x3]  ;;  %v77_v4 = vld [vmem:[%s1491_s1 + $0x8] sm:$0xff] }
  0x10   :  { %v76_v1 = vld [vmem:[%s1491_s1] sm:$0xff]  ;;  %v93_v3 = vsel %vm91_vm0, %v79_v0, 0 }
  0x11   :  { %1016 = vmatpush3.bf16.msra.mxu0 %v93_v3  ;;  %v78_v5 = vpack.c.bf16 %v77_v4, %v76_v1 }
  0x12   :  { %1029 = vmatprep.subr.bf16.mxu0 %v1151_v2 }
  0x14   :  { %1018 = vmatmul.mubr.msk.bf16.vlgmr.msra.gmra.mrb[0].mxu0 %vm87_vm2, %v78_v5 }
  0x15   :  { %1033 = vmatprep.mubr.msk.bf16.mxu0 %vm1152_vm1, %v1151_v2 }
  0x16   :  { %28 = vsyncpa [#allocation3], 0  ;;  %s1492_s7 = sld [smem:[#allocation8_spill]]  ;;  %s1493_s4 = sld [smem:[#allocation7_spill]]  ;;  %vm162_vm3 = vcmask 261120   ;;  %vm255_vm4 = vcmask 1043456  }
  0x17   :  { %s1494_s25 = sld [smem:[#allocation10_spill]]  ;;  %s1495_s6 = sld [smem:[#allocation12_spill]]  ;;  %vm207_vm5 = vcmask 195584   ;;  %vm240_vm6 = vcmask 1041409   ;;  %v1113_v53 = vld [vmem:[%s1463_s9] sm:$0xff]   ;;  %vm439_vm7 = vcmask 64512  }
  0x18   :  { %s1496_s28 = sld [smem:[#allocation9_spill]]  ;;  %v1114_v55 = vld [vmem:[%s1463_s9 + $0x8] ss:$0 sps:$4 sm:$0xff]   ;;  %s1497_s5 = sld [smem:[#allocation11_spill]]  ;;  %v431_v63 = vld [vmem:[%s1464_s10] sm:$0xf] }
  0x19   :  { %v387_v56 = vsel %vm255_vm4, %v1114_v55, 0  ;;  %v444_v4 = vsel %vm255_vm4, %v431_v63, 0 }
  0x1c   :  { %v1109_v6 = vld [vmem:[%s1492_s7] sm:$0xff]   ;;  %v1110_v7 = vld [vmem:[%s1492_s7 + $0x8] sm:$0xff]  }
  0x1d   :  { %1022 = vmatpush3.bf16.msra.mxu1 %v1109_v6  ;;  %v942_v8 = vld [vmem:[%s1493_s4] ss:$0 sm:$0xff]  ;;  %v1112_v19 = vld [vmem:[%s1494_s25 + $0x8] ss:$0 sps:$4 sm:$0xff]  }
  0x1e   :  { %1023 = vmatprep.subr.bf16.mxu1 %v1151_v2  ;;  %v1111_v18 = vld [vmem:[%s1494_s25] sm:$0xff]   ;;  %v257_v20 = vsel %vm255_vm4, %v1112_v19, 0  ;;  %v1116_v57 = vld [vmem:[%s1495_s6 + $0x8] sm:$0xff]   ;;  %v1153_v19 = vmov 1966171168  }
  0x1f   :  { %1030 = vmatpush3.bf16.msra.mxu0 %v1111_v18  ;;  %v1115_v21 = vld [vmem:[%s1495_s6] sm:$0xff]   ;;  %v1118_v18 = vld [vmem:[%s1466_s12 + $0x8] sm:$0xff]  }
  0x20   :  { %1031 = vmatprep.subr.bf16.mxu0 %v1151_v2  ;;  %v944_v22 = vld [vmem:[%s1496_s28] ss:$0 sm:$0xff] }
  0x21   :  { %1024 = vmatpush3.bf16.msra.mxu1 %v1110_v7  ;;  %v948_v58 = vld [vmem:[%s1497_s5] ss:$0 sm:$0xff] }
  0x22   :  { %1037 = vmatprep.subr.bf16.mxu1 %v1151_v2 }
  0x23   :  { %1032 = vmatpush3.bf16.msra.mxu0 %v257_v20  ;;  %v488_v20 = vunpack.c.l.s4 %v1153_v19 }
  0x24   :  { %1045 = vmatprep.subr.bf16.mxu0 %v1151_v2 }
  0xe7   :  { %v129_v9 = vpop.f32.mrb[0].mxu0 }
  0xe8   :  { %v130_v10 = vadd.f32 %v942_v8, %v129_v9  ;;  %v1019_v11 = vpop.f32.mrb[1].mxu0  ;;  %v952_v9 = vld [vmem:[%s1462_s8] ss:$0 sm:$0xff] }
  0xe9   :  { %v132_v12 = vpop.f32.mrb[2].mxu0 }
  0xea   :  { %v133_v13 = vadd.f32 %v942_v8, %v132_v12  ;;  %v1020_v14 = vpop.f32.mrb[3].mxu0  ;;  %v136_v15 = vmax.f32 %v130_v10, 0.0 }
  0xec   :  { %v137_v16 = vmax.f32 %v133_v13, 0.0 }
  0xee   :  { %v138_v17 = vpack.c.bf16 %v137_v16, %v136_v15 }
  0xf0   :  { %1026 = vmatmul.mubr.msk.bf16.vlgmr.msra.gmra.mrb[0].mxu1 %vm162_vm3, %v138_v17  ;;  %v1117_v17 = vld [vmem:[%s1466_s12] sm:$0xff]  }
  0xf1   :  { %1041 = vmatprep.mubr.msk.bf16.mxu1 %vm1152_vm1, %v1151_v2  ;;  %1038 = vmatpush3.bf16.msra.mxu1 %v1115_v21  ;;  %v490_v21 = vlaneseq }
  0xf2   :  { %1039 = vmatprep.subr.bf16.mxu1 %v1151_v2 }
  0xf5   :  { %1040 = vmatpush3.bf16.msra.mxu1 %v1116_v57 }
  0xf6   :  { %1053 = vmatprep.subr.bf16.mxu1 %v1151_v2 }
 0x1c3   :  { %v200_v23 = vpop.f32.mrb[0].mxu1 }
 0x1c4   :  { %v201_v24 = vadd.f32 %v944_v22, %v200_v23  ;;  %v1027_v25 = vpop.f32.mrb[1].mxu1  ;;  %v491_v23 = vshrl.u32 %v490_v21, 7 }
 0x1c5   :  { %v203_v26 = vpop.f32.mrb[2].mxu1 }
 0x1c6   :  { %v208_v27 = vsel %vm207_vm5, %v201_v24, 0.0  ;;  %v204_v28 = vadd.f32 %v944_v22, %v203_v26  ;;  %v1028_v29 = vpop.f32.mrb[3].mxu1  ;;  %v367_v31 = vmax.f32 %v201_v24, 0.0  ;;  %v489_v22 = vunpack.c.0.s8 %v488_v20  ;;  %v959_v24 = vld [vmem:[%s1465_s11] ss:$0 sm:$0xff] }
 0x1c7   :  { %v209_v30 = vrot.slane %v208_v27, 4 }
 0x1c8   :  { %v215_v32 = vsel %vm207_vm5, %v204_v28, 0.0  ;;  %v368_v33 = vmax.f32 %v204_v28, 0.0  ;;  %v492_v25 = vsub.s32 %v489_v22, %v491_v23 }
 0x1c9   :  { %v210_v34 = vadd.f32 %v209_v30, %v208_v27  ;;  %v216_v35 = vrot.slane %v215_v32, 4 }
 0x1ca   :  { %v370_v36 = vpack.c.bf16 %v368_v33, %v367_v31  ;;  %v511_v31 = vsub.s32 0, %v491_v23  ;;  %v1123_v23 = vld [vmem:[%s1472_s18] sm:$0xff]  }
 0x1cb   :  { %v211_v37 = vrot.slane %v210_v34, 2  ;;  %v217_v38 = vadd.f32 %v216_v35, %v215_v32 }
 0x1cd   :  { %v212_v39 = vadd.f32 %v211_v37, %v210_v34  ;;  %v218_v40 = vrot.slane %v217_v38, 2 }
 0x1cf   :  { %v213_v41 = vrot.slane %v212_v39, 1  ;;  %v219_v42 = vadd.f32 %v218_v40, %v217_v38 }
 0x1d1   :  { %v214_v43 = vadd.f32 %v213_v41, %v212_v39  ;;  %v220_v44 = vrot.slane %v219_v42, 1 }
 0x1d3   :  { %v222_v45 = vmul.f32 0.125, %v214_v43  ;;  %v221_v46 = vadd.f32 %v220_v44, %v219_v42  ;;  %v1119_v43 = vld [vmem:[%s1468_s14] sm:$0xff]   ;;  %v1120_v44 = vld [vmem:[%s1468_s14 + $0x8] ss:$0 sps:$4 sm:$0xff]  }
 0x1d5   :  { %v224_v47 = vpack.c.bf16 %v222_v45, %v222_v45  ;;  %v223_v48 = vmul.f32 0.125, %v221_v46  ;;  %v638_v45 = vsel %vm255_vm4, %v1120_v44, 0  ;;  %v1121_v46 = vld [vmem:[%s1470_s16] sm:$0xff]  }
 0x1d7   :  { %v225_v49 = vpack.c.bf16 %v223_v48, %v223_v48  ;;  %v238_v50 = vunpack.c.l.b16 %v224_v47  ;;  %v961_v47 = vld [vmem:[%s1467_s13] ss:$0 sm:$0xff] }
 0x1d9   :  { %v239_v51 = vunpack.c.l.b16 %v225_v49 }
 0x1db   :  { %v241_v52 = vsel %vm240_vm6, %v239_v51, %v238_v50 }
 0x1dc   :  { %v242_v54 = vpack.c.b16 %v241_v52, %v241_v52 }
 0x1de   :  { %1034 = vmatmul.mubr.msk.bf16.vlgmr.msra.gmra.mrb[4].mxu0 %vm207_vm5, %v242_v54 }
 0x1df   :  { %1046 = vmatpush3.bf16.msra.mxu0 %v1113_v53  ;;  %1049 = vmatprep.mubr.msk.bf16.mxu0 %vm1152_vm1, %v1151_v2 }
 0x1e0   :  { %1047 = vmatprep.subr.bf16.mxu0 %v1151_v2 }
 0x1e3   :  { %1048 = vmatpush3.bf16.msra.mxu0 %v387_v56 }
 0x1e4   :  { %1059 = vmatprep.subr.bf16.mxu0 %v1151_v2 }
 0x1e6   :  { %1050 = vmatmul.mubr.msk.bf16.vlgmr.msra.gmra.mrb[8].mxu0 %vm207_vm5, %v370_v36 }
 0x1e7   :  { %1063 = vmatprep.mubr.msk.bf16.mxu0 %vm1152_vm1, %v1151_v2  ;;  %1060 = vmatpush3.bf16.msra.mxu0 %v1117_v17 }
 0x1e8   :  { %1061 = vmatprep.subr.bf16.mxu0 %v1151_v2 }
 0x1eb   :  { %1062 = vmatpush3.bf16.msra.mxu0 %v1118_v18 }
 0x1ec   :  { %1075 = vmatprep.subr.bf16.mxu0 %v1151_v2 }
 0x2b1   :  { %v293_v59 = vpop.f32.mrb[4].mxu0 }
 0x2b2   :  { %v294_v60 = vadd.f32 %v948_v58, %v293_v59  ;;  %v1035_v61 = vpop.f32.mrb[5].mxu0 }
 0x2b3   :  { %v296_v62 = vpop.f32.mrb[6].mxu0 }
 0x2b4   :  { %v299_v0 = vmax.f32 %v294_v60, 0.0  ;;  %v1036_v1 = vpop.f32.mrb[7].mxu0 }
 0x2b6   :  { %v300_v3 = vpack.c.bf16 %v299_v0, %v299_v0 }
 0x2b8   :  { %1042 = vmatmul.mubr.msk.bf16.vlgmr.msra.gmra.mrb[4].mxu1 %vm162_vm3, %v300_v3 }
 0x2b9   :  { %v423_v5 = vpop.f32.mrb[8].mxu0  ;;  %1054 = vmatpush3.bf16.msra.mxu1 %v444_v4  ;;  %1055 = vmatprep.mubr.msk.bf16.mxu1 %vm1152_vm1, %v1151_v2 }
 0x2ba   :  { %v1051_v6 = vpop.f32.mrb[9].mxu0  ;;  %1067 = vmatprep.subr.bf16.mxu1 %v1151_v2 }
 0x2bb   :  { %v426_v7 = vpop.f32.mrb[10].mxu0 }
 0x2bc   :  { %v1052_v8 = vpop.f32.mrb[11].mxu0 }
 0x38b   :  { %v361_v10 = vpop.f32.mrb[4].mxu1 }
 0x38c   :  { %v362_v11 = vadd.f32 %v952_v9, %v361_v10  ;;  %v1043_v12 = vpop.f32.mrb[5].mxu1 }
 0x38d   :  { %v364_v13 = vpop.f32.mrb[6].mxu1 }
 0x38e   :  { %v369_v14 = vmax.f32 %v362_v11, 0.0  ;;  %v1044_v15 = vpop.f32.mrb[7].mxu1  ;;  %v1122_v13 = vld [vmem:[%s1470_s16 + $0x8] sm:$0xff]  }
 0x390   :  { %v430_v16 = vpack.c.bf16 %v369_v14, %v369_v14  ;;  %v752_v14 = vld [vmem:[%s1473_s19] sm:$0xf] }
 0x391   :  { %v757_v15 = vsel %vm255_vm4, %v752_v14, 0 }
 0x392   :  { %1056 = vmatmul.mubr.msk.bf16.vlgmr.msra.gmra.mrb[8].mxu1 %vm439_vm7, %v430_v16  ;;  %v965_v16 = vld [vmem:[%s1469_s15] ss:$0 sm:$0xff] }
 0x393   :  { %1071 = vmatprep.mubr.msk.bf16.mxu1 %vm1152_vm1, %v1151_v2  ;;  %1068 = vmatpush3.bf16.msra.mxu1 %v1119_v43 }
 0x394   :  { %1069 = vmatprep.subr.bf16.mxu1 %v1151_v2 }
 0x397   :  { %1070 = vmatpush3.bf16.msra.mxu1 %v638_v45 }
 0x398   :  { %1083 = vmatprep.subr.bf16.mxu1 %v1151_v2 }
 0x465   :  { %v480_v26 = vpop.f32.mrb[8].mxu1 }
 0x466   :  { %v481_v27 = vadd.f32 %v959_v24, %v480_v26  ;;  %v1057_v28 = vpop.f32.mrb[9].mxu1 }
 0x467   :  { %v483_v29 = vpop.f32.mrb[10].mxu1 }
 0x468   :  { %v493_v30 = vrot.slane %v481_v27, %v492_v25  ;;  %v1058_v32 = vpop.f32.mrb[11].mxu1  ;;  %v969_v27 = vld [vmem:[%s1471_s17] ss:$0 sm:$0xff] }
 0x46a   :  { %v494_v33 = vcombine.high %v493_v30, %v493_v30  ;;  %v501_v34 = vrot.slane %v493_v30, %v492_v25 }
 0x46c   :  { %v508_v35 = vrot.slane %v494_v33, %v492_v25  ;;  %v512_v36 = vrot.slane %v501_v34, %v511_v31  ;;  %v1124_v25 = vld [vmem:[%s1472_s18 + $0x8] ss:$0 sps:$4 sm:$0xff]  }
 0x46d   :  { %v809_v26 = vsel %vm255_vm4, %v1124_v25, 0 }
 0x46e   :  { %v516_v37 = vrot.slane %v508_v35, %v511_v31  ;;  %v519_v38 = vadd.f32 %v512_v36, %v423_v5 }
 0x470   :  { %v520_v39 = vadd.f32 %v516_v37, %v426_v7  ;;  %v521_v40 = vmax.f32 %v519_v38, 0.0  ;;  %v1125_v38 = vld [vmem:[%s1475_s21] sm:$0xff]  }
 0x472   :  { %v522_v41 = vmax.f32 %v520_v39, 0.0  ;;  %v1126_v39 = vld [vmem:[%s1475_s21 + $0x8] sm:$0xff]   ;;  %s1154_s21 = smov [#allocation2]  }
 0x473   :  { %s934_s12 = sshll.u32 %s1154_s21, 4  ;;  %s935_s12 = int_to_ptr.vmem [resolvable:$true] %s934_s12 }
 0x474   :  { %v523_v42 = vpack.c.bf16 %v522_v41, %v521_v40  ;;  %v977_v41 = vld [vmem:[%s1474_s20] ss:$0 sm:$0xff]  ;;  %s1127_s20 = scalar_lea.vmem %s935_s12, 32  ;;  %p1132_p1 = scmp.lt.s32.totalorder %s935_s12, %s935_s12 }
 0x475   :  { %p1128_p0 = scmp.ne.s32.totalorder %s935_s12, %s1127_s20  ;;  %p1133_p2 = scmp.lt.s32.totalorder %s1127_s20, %s1127_s20 }
 0x476   :  { %1064 = vmatmul.mubr.msk.bf16.vlgmr.msra.gmra.mrb[12].mxu0 %vm162_vm3, %v523_v42 }
 0x477   :  { %1079 = vmatprep.mubr.msk.bf16.mxu0 %vm1152_vm1, %v1151_v2  ;;  %1076 = vmatpush3.bf16.msra.mxu0 %v1121_v46  ;;  %p1134_p3 = por %p1133_p2, %p1132_p1 }
 0x478   :  { %1077 = vmatprep.subr.bf16.mxu0 %v1151_v2 }
 0x479   :  { %p1135_p4 = pnand %p1134_p3, %p1128_p0 }
 0x47b   :  { %1078 = vmatpush3.bf16.msra.mxu0 %v1122_v13 }
 0x47c   :  { %1089 = vmatprep.subr.bf16.mxu0 %v1151_v2 }
 0x549   :  { %v584_v48 = vpop.f32.mrb[12].mxu0 }
 0x54a   :  { %v585_v49 = vadd.f32 %v961_v47, %v584_v48  ;;  %v1065_v50 = vpop.f32.mrb[13].mxu0 }
 0x54b   :  { %v587_v51 = vpop.f32.mrb[14].mxu0 }
 0x54c   :  { %v591_v52 = vsel %vm207_vm5, %v585_v49, 0.0  ;;  %v588_v53 = vadd.f32 %v961_v47, %v587_v51  ;;  %v1066_v54 = vpop.f32.mrb[15].mxu0 }
 0x54d   :  { %v592_v55 = vrot.slane %v591_v52, 4 }
 0x54e   :  { %v598_v56 = vsel %vm207_vm5, %v588_v53, 0.0 }
 0x54f   :  { %v593_v57 = vadd.f32 %v592_v55, %v591_v52  ;;  %v599_v58 = vrot.slane %v598_v56, 4 }
 0x551   :  { %v594_v59 = vrot.slane %v593_v57, 2  ;;  %v600_v60 = vadd.f32 %v599_v58, %v598_v56 }
 0x553   :  { %v595_v61 = vadd.f32 %v594_v59, %v593_v57  ;;  %v601_v62 = vrot.slane %v600_v60, 2 }
 0x555   :  { %v596_v63 = vrot.slane %v595_v61, 1  ;;  %v602_v0 = vadd.f32 %v601_v62, %v600_v60 }
 0x557   :  { %v597_v1 = vadd.f32 %v596_v63, %v595_v61  ;;  %v603_v3 = vrot.slane %v602_v0, 1 }
 0x559   :  { %v605_v4 = vmul.f32 0.125, %v597_v1  ;;  %v604_v5 = vadd.f32 %v603_v3, %v602_v0 }
 0x55b   :  { %v607_v6 = vpack.c.bf16 %v605_v4, %v605_v4  ;;  %v606_v7 = vmul.f32 0.125, %v604_v5 }
 0x55d   :  { %v608_v8 = vpack.c.bf16 %v606_v7, %v606_v7  ;;  %v621_v9 = vunpack.c.l.b16 %v607_v6 }
 0x55f   :  { %v622_v10 = vunpack.c.l.b16 %v608_v8 }
 0x561   :  { %v623_v11 = vsel %vm240_vm6, %v622_v10, %v621_v9 }
 0x562   :  { %v624_v12 = vpack.c.b16 %v623_v11, %v623_v11 }
 0x564   :  { %1072 = vmatmul.mubr.msk.bf16.vlgmr.msra.gmra.mrb[12].mxu1 %vm207_vm5, %v624_v12 }
 0x565   :  { %1085 = vmatprep.mubr.msk.bf16.mxu1 %vm1152_vm1, %v1151_v2  ;;  %1084 = vmatpush3.bf16.msra.mxu1 %v757_v15 }
 0x566   :  { %1097 = vmatprep.subr.bf16.mxu1 %v1151_v2 }
 0x637   :  { %v674_v17 = vpop.f32.mrb[12].mxu1 }
 0x638   :  { %v675_v18 = vadd.f32 %v965_v16, %v674_v17  ;;  %v1073_v19 = vpop.f32.mrb[13].mxu1 }
 0x639   :  { %v677_v20 = vpop.f32.mrb[14].mxu1 }
 0x63a   :  { %v680_v21 = vmax.f32 %v675_v18, 0.0  ;;  %v1074_v22 = vpop.f32.mrb[15].mxu1 }
 0x63c   :  { %v681_v24 = vpack.c.bf16 %v680_v21, %v680_v21 }
 0x63e   :  { %1080 = vmatmul.mubr.msk.bf16.vlgmr.msra.gmra.mrb[16].mxu0 %vm162_vm3, %v681_v24 }
 0x63f   :  { %1090 = vmatpush3.bf16.msra.mxu0 %v1123_v23  ;;  %1093 = vmatprep.mubr.msk.bf16.mxu0 %vm1152_vm1, %v1151_v2 }
 0x640   :  { %1091 = vmatprep.subr.bf16.mxu0 %v1151_v2 }
 0x643   :  { %1092 = vmatpush3.bf16.msra.mxu0 %v809_v26 }
 0x646   :  { %1094 = vmatmul.mubr.msk.bf16.vlgmr.msra.gmra.mrb[20].mxu0 %vm207_vm5, %v624_v12 }
 0x711   :  { %v742_v28 = vpop.f32.mrb[16].mxu0 }
 0x712   :  { %v743_v29 = vadd.f32 %v969_v27, %v742_v28  ;;  %v1081_v30 = vpop.f32.mrb[17].mxu0 }
 0x713   :  { %v745_v31 = vpop.f32.mrb[18].mxu0 }
 0x714   :  { %v751_v32 = vpack.c.bf16 %v743_v29, %v743_v29  ;;  %v1082_v33 = vpop.f32.mrb[19].mxu0 }
 0x716   :  { %1086 = vmatmul.mubr.msk.bf16.vlgmr.msra.gmra.mrb[16].mxu1 %vm439_vm7, %v751_v32 }
 0x717   :  { %1101 = vmatprep.mubr.msk.bf16.mxu1 %vm1152_vm1, %v1151_v2  ;;  %1098 = vmatpush3.bf16.msra.mxu1 %v1125_v38 }
 0x718   :  { %1099 = vmatprep.subr.bf16.mxu1 %v1151_v2  ;;  %v978_v2 = vld [vmem:[%s1476_s22] ss:$0 sm:$0xff] }
 0x719   :  { %v845_v34 = vpop.f32.mrb[20].mxu0 }
 0x71a   :  { %v1095_v35 = vpop.f32.mrb[21].mxu0 }
 0x71b   :  { %v848_v36 = vpop.f32.mrb[22].mxu0  ;;  %1100 = vmatpush3.bf16.msra.mxu1 %v1126_v39 }
 0x71c   :  { %v1096_v37 = vpop.f32.mrb[23].mxu0 }
 0x7e9   :  { %v793_v40 = vpop.f32.mrb[16].mxu1 }
 0x7ea   :  { %v846_v42 = vadd.f32 %v845_v34, %v793_v40  ;;  %v1087_v43 = vpop.f32.mrb[17].mxu1 }
 0x7eb   :  { %v796_v44 = vpop.f32.mrb[18].mxu1 }
 0x7ec   :  { %v858_v45 = vadd.f32 %v977_v41, %v846_v42  ;;  %v1088_v46 = vpop.f32.mrb[19].mxu1 }
 0x7ee   :  { %v859_v47 = vmax.f32 %v858_v45, 0.0 }
 0x7f0   :  { %v860_v48 = vpack.c.bf16 %v859_v47, %v859_v47 }
 0x7f2   :  { %1102 = vmatmul.mubr.msk.bf16.vlgmr.msra.gmra.mrb[20].mxu1 %vm162_vm3, %v860_v48 }
 0x8c5   :  { %v921_v49 = vpop.f32.mrb[20].mxu1 }
 0x8c6   :  { %v922_v50 = vadd.f32 %v978_v2, %v921_v49  ;;  %v1103_v51 = vpop.f32.mrb[21].mxu1 }
 0x8c7   :  { %v924_v52 = vpop.f32.mrb[22].mxu1 }
 0x8c8   :  { %927 = vst [vmem:[#allocation2] sm:$0x3] %v922_v50  ;;  %v1104_v53 = vpop.f32.mrb[23].mxu1 }
 0x8c9   :  { %1138 = shalt.err (!%p1135_p4)
}
 0x8ca   :  { %s1139_s22 = scalar_lea.hbm %s1477_s23, 32 }
 0x8cb   :  { %p1140_p5 = scmp.ne.s32.totalorder %s1477_s23, %s1139_s22  ;;  %p1143_p6 = scmp.lt.u32.totalorder %s1139_s22, %s1477_s23 }
 0x8cd   :  { %p1145_p7 = pnand %p1143_p6, %p1140_p5 }
 0x8cf   :  { %1148 = shalt.err (!%p1145_p7)
}
 0x8d0   :  { %937 = dma.vmem_to_hbm [thread:$0]  %s935_s12, 32, %s1477_s23, [#allocation3]  }
 0x8d1   :  { %1149 = dma.done.wait [#allocation3], 32  }
 0x8d2   :  { %1150 = vsyncadd [#allocation3], 4294967264 }
 0x8d3   :  { %941 = vsyncpa [#allocation3], 1 }

</bundles_post_ra>
